<compile_context>
chip_gen: v6e
topology: v6e:2x2x1
jax: 0.10.0
libtpu: 0.0.40
codegen_flags: <defaults>
</compile_context>

<pallas_src>
import numpy as np
import jax
import jax.numpy as jnp
from jax import lax
from jax.experimental import pallas as pl
from jax.experimental.pallas import tpu as pltpu


# ----------------------------------------------------------------------------
# helpers (match the PyTorch module)
# ----------------------------------------------------------------------------
def _make_divisible(v, divisor, min_value=None):
    if min_value is None:
        min_value = divisor
    new_v = max(min_value, int(v + divisor / 2) // divisor * divisor)
    if new_v < 0.9 * v:
        new_v += divisor
    return new_v


def _h_sigmoid(x):
    # relu6(x + 3) / 6
    return jnp.clip(x + 3.0, 0.0, 6.0) * (1.0 / 6.0)


def _h_swish(x):
    return x * _h_sigmoid(x)


# ----------------------------------------------------------------------------
# fused InvertedResidual kernel (built per static config)
# ----------------------------------------------------------------------------
def _build_kernel(*, hidden, k, H, W, HW, HWp, expand, use_se, use_hs, identity):
    pad = (k - 1) // 2
    act = _h_swish if use_hs else (lambda v: jnp.maximum(v, 0.0))
    bf16 = jnp.bfloat16

    def kernel(*refs):
        i = 3
        x_ref, row_ref, col_ref = refs[0], refs[1], refs[2]
        if expand:
            w_exp, bn1_s, bn1_b = refs[i], refs[i + 1], refs[i + 2]; i += 3
        w_dw, bn2_s, bn2_b = refs[i], refs[i + 1], refs[i + 2]; i += 3
        if use_se:
            w_se1, b_se1, w_se2, b_se2 = refs[i], refs[i + 1], refs[i + 2], refs[i + 3]; i += 4
        w_proj, bn3_s, bn3_b = refs[i], refs[i + 1], refs[i + 2]; i += 3
        out_ref = refs[i]

        row = row_ref[...]                              # (1, HWp) int32, >= H on padded lanes
        col = col_ref[...]                              # (1, HWp) int32, >= W on padded lanes

        # ---- 1x1 expansion conv (bf16 MXU operands, f32 accumulate) + BN + act ----
        if expand:
            h = jnp.dot(w_exp[...], x_ref[0].astype(bf16),
                        preferred_element_type=jnp.float32)
            h = act(h * bn1_s[...] + bn1_b[...])
        else:
            h = x_ref[0]

        # ---- depthwise k x k conv (stride 1) on flattened HW: roll (XLU) + deduped masks ----
        w = w_dw[...]                                   # (hidden, k*k), hoisted single load
        # One roll + one column mask per dx, shared across all dy.
        h_x = []
        for dx in range(-pad, pad + 1):
            if dx == 0:
                h_x.append(h)
            else:
                r = pltpu.roll(h, shift=(-dx) % HWp, axis=1)          # r[p] = h[p + dx]
                cmask = (col < (W - dx)) if dx > 0 else (col >= (-dx))
                h_x.append(jnp.where(cmask, r, 0.0))
        # Accumulate the dx taps per row offset, then one roll + one vertical mask per dy.
        acc = None
        for dy in range(-pad, pad + 1):
            part = None
            for dx in range(-pad, pad + 1):
                idx = (dy + pad) * k + (dx + pad)
                t = w[:, idx:idx + 1] * h_x[dx + pad]
                part = t if part is None else part + t
            if dy != 0:
                part = pltpu.roll(part, shift=(-dy * W) % HWp, axis=1)  # part[p] <- part[p+dy*W]
                vmask = (row < (H - dy)) if dy > 0 else (row >= (-dy))
                part = jnp.where(vmask, part, 0.0)
            acc = part if acc is None else acc + part
        h = acc * bn2_s[...] + bn2_b[...]

        # ---- Squeeze-Excite (global pool over valid lanes, tiny bf16 MXU matmuls) ----
        def se(v):
            vs = jnp.where(row < H, v, 0.0) if HWp != HW else v
            pooled = jnp.sum(vs, axis=1, keepdims=True) * (1.0 / HW)     # (hidden, 1)
            pooled_b = jnp.broadcast_to(pooled, (hidden, 128)).astype(bf16)
            m = jnp.dot(w_se1[...], pooled_b,
                        preferred_element_type=jnp.float32) + b_se1[...]
            m = jnp.maximum(m, 0.0).astype(bf16)
            g = _h_sigmoid(jnp.dot(w_se2[...], m,
                                   preferred_element_type=jnp.float32) + b_se2[...])
            return v * g[:, 0:1]                                         # per-channel gate

        if expand:
            # ... dwconv, BN, SE, act, proj ...   (inp != hidden_dim branch)
            if use_se:
                h = se(h)
            h = act(h)
        else:
            # ... dwconv, BN, act, SE, proj ...   (inp == hidden_dim branch)
            h = act(h)
            if use_se:
                h = se(h)

        # ---- 1x1 projection conv + BN (+ residual) ----
        y = jnp.dot(w_proj[...], h.astype(bf16), preferred_element_type=jnp.float32)
        y = y * bn3_s[...] + bn3_b[...]
        if identity:
            y = y + x_ref[0]                            # re-read x here (short live range)
        out_ref[0] = y                                  # lane-dense (oup, HWp) store

    return kernel


# ----------------------------------------------------------------------------
# wrapper
# ----------------------------------------------------------------------------
def _pick_vmem_limit():
    # Raise the scoped-VMEM limit (v5e default is only 16 MiB) but stay within physical
    # VMEM on v7x (64 MiB).
    try:
        cap = int(pltpu.get_tpu_info().vmem_capacity_bytes)
        return int(max(min(cap * 3 // 4, 96 << 20), 16 << 20))
    except Exception:
        return 32 << 20


def inverted_residual_forward(x_nchw, params, *, inp, hidden_dim, oup,
                              kernel_size, stride, use_se, use_hs):
    assert stride == 1, "TODO(synk): stride=2 not implemented in the fused kernel"
    assert kernel_size % 2 == 1
    B, Cin, H, W = x_nchw.shape
    assert Cin == inp
    HW = H * W
    HWp = ((HW + 127) // 128) * 128                 # pad HW to a lane-dense multiple of 128
    expand = inp != hidden_dim
    identity = (stride == 1) and (inp == oup)

    x_flat = x_nchw.astype(jnp.float32).reshape(B, Cin, HW)
    if HWp != HW:
        x_flat = jnp.pad(x_flat, ((0, 0), (0, 0), (0, HWp - HW)))

    # Host-side row/col tables (padded lanes are marked out-of-image).
    pos = np.arange(HWp, dtype=np.int64)
    row_tbl = np.where(pos < HW, pos // W, H).astype(np.int32).reshape(1, HWp)
    col_tbl = np.where(pos < HW, pos % W, W).astype(np.int32).reshape(1, HWp)

    def fold_bn(bn):
        scale = bn["gamma"] / jnp.sqrt(bn["var"] + 1e-5)
        shift = bn["beta"] - bn["mean"] * scale
        return (scale.reshape(-1, 1).astype(jnp.float32),
                shift.reshape(-1, 1).astype(jnp.float32))

    inputs = [x_flat, jnp.asarray(row_tbl), jnp.asarray(col_tbl)]
    in_specs = [pl.BlockSpec((1, Cin, HWp), lambda b: (b, 0, 0)),
                pl.BlockSpec((1, HWp), lambda b: (0, 0)),
                pl.BlockSpec((1, HWp), lambda b: (0, 0))]

    def add(a, dtype=jnp.float32):
        a = jnp.asarray(a, dtype)
        inputs.append(a)
        in_specs.append(pl.BlockSpec(a.shape, lambda b: (0, 0)))

    if expand:
        s1, b1 = fold_bn(params["bn1"])
        add(params["w_exp"], jnp.bfloat16); add(s1); add(b1)
    s2, b2 = fold_bn(params["bn2"])
    add(params["w_dw"].reshape(hidden_dim, kernel_size * kernel_size)); add(s2); add(b2)
    if use_se:
        add(params["w_se1"], jnp.bfloat16); add(params["b_se1"].reshape(-1, 1))
        add(params["w_se2"], jnp.bfloat16); add(params["b_se2"].reshape(-1, 1))
    s3, b3 = fold_bn(params["bn3"])
    add(params["w_proj"], jnp.bfloat16); add(s3); add(b3)

    kernel = _build_kernel(hidden=hidden_dim, k=kernel_size, H=H, W=W, HW=HW, HWp=HWp,
                           expand=expand, use_se=use_se, use_hs=use_hs, identity=identity)

    out = pl.pallas_call(
        kernel,
        out_shape=jax.ShapeDtypeStruct((B, oup, HWp), jnp.float32),
        grid=(B,),
        in_specs=in_specs,
        out_specs=pl.BlockSpec((1, oup, HWp), lambda b: (b, 0, 0)),
        compiler_params=pltpu.CompilerParams(
            dimension_semantics=("parallel",),
            vmem_limit_bytes=_pick_vmem_limit()),
    )(*inputs)

    return out[:, :, :HW].reshape(B, oup, H, W)


# ----------------------------------------------------------------------------
# parameters (deterministic) + pure-JAX reference for a correctness check
# ----------------------------------------------------------------------------
def init_params(key, *, inp, hidden_dim, oup, kernel_size, use_se):
    mid = _make_divisible(hidden_dim // 4, 8)
    ks = jax.random.split(key, 10)

    def bn_params(k, c):
        k1, k2, k3, k4 = jax.random.split(k, 4)
        return dict(gamma=jax.random.uniform(k1, (c,), jnp.float32, 0.5, 1.5),
                    beta=0.1 * jax.random.normal(k2, (c,), jnp.float32),
                    mean=0.1 * jax.random.normal(k3, (c,), jnp.float32),
                    var=jax.random.uniform(k4, (c,), jnp.float32, 0.5, 1.5))

    p = dict(
        w_exp=jax.random.normal(ks[0], (hidden_dim, inp), jnp.float32) / np.sqrt(inp),
        bn1=bn_params(ks[1], hidden_dim),
        w_dw=jax.random.normal(ks[2], (hidden_dim, kernel_size, kernel_size), jnp.float32) / kernel_size,
        bn2=bn_params(ks[3], hidden_dim),
        w_proj=jax.random.normal(ks[4], (oup, hidden_dim), jnp.float32) / np.sqrt(hidden_dim),
        bn3=bn_params(ks[5], oup),
    )
    if use_se:
        p.update(
            w_se1=jax.random.normal(ks[6], (mid, hidden_dim), jnp.float32) / np.sqrt(hidden_dim),
            b_se1=0.1 * jax.random.normal(ks[7], (mid,), jnp.float32),
            w_se2=jax.random.normal(ks[8], (hidden_dim, mid), jnp.float32) / np.sqrt(mid),
            b_se2=0.1 * jax.random.normal(ks[9], (hidden_dim,), jnp.float32),
        )
    return p


def _bf16(a):
    # Mirror the kernel's bf16 MXU operand rounding so the reference is numerically comparable.
    return a.astype(jnp.bfloat16).astype(jnp.float32)


def inverted_residual_ref(x, p, *, inp, hidden_dim, oup, kernel_size, stride, use_se, use_hs):
    assert stride == 1
    expand = inp != hidden_dim
    identity = (stride == 1) and (inp == oup)
    act = _h_swish if use_hs else (lambda v: jnp.maximum(v, 0.0))
    hp = lax.Precision.HIGHEST
    B, C, H, W = x.shape

    def bnorm(v, bn):
        scale = bn["gamma"] / jnp.sqrt(bn["var"] + 1e-5)
        shift = bn["beta"] - bn["mean"] * scale
        return v * scale.reshape(1, -1, 1, 1) + shift.reshape(1, -1, 1, 1)

    h = x
    if expand:
        h = jnp.einsum("oc,bchw->bohw", _bf16(p["w_exp"]), _bf16(x), precision=hp)
        h = act(bnorm(h, p["bn1"]))
    pad = (kernel_size - 1) // 2
    hpd = jnp.pad(h, ((0, 0), (0, 0), (pad, pad), (pad, pad)))
    dw = None
    for i in range(kernel_size):
        for j in range(kernel_size):
            t = hpd[:, :, i:i + H, j:j + W] * p["w_dw"][:, i, j].reshape(1, -1, 1, 1)
            dw = t if dw is None else dw + t
    h = bnorm(dw, p["bn2"])

    def se_fn(v):
        pooled = jnp.mean(v, axis=(2, 3))
        m = jnp.maximum(_bf16(pooled) @ _bf16(p["w_se1"]).T + p["b_se1"][None, :], 0.0)
        g = _h_sigmoid(_bf16(m) @ _bf16(p["w_se2"]).T + p["b_se2"][None, :])
        return v * g[:, :, None, None]

    if expand:
        if use_se:
            h = se_fn(h)
        h = act(h)
    else:
        h = act(h)
        if use_se:
            h = se_fn(h)
    y = jnp.einsum("oc,bchw->bohw", _bf16(p["w_proj"]), _bf16(h), precision=hp)
    y = bnorm(y, p["bn3"])
    if identity:
        y = y + x
    return y


# ----------------------------------------------------------------------------
# main
# ----------------------------------------------------------------------------
if __name__ == "__main__":
    # MobileNetV3-style block: expansion + SE + h-swish, stride 1 with residual.
    INP, HID, OUP, K, STRIDE = 32, 64, 32, 3, 1
    USE_SE, USE_HS = True, True
    B, H, W = 2, 16, 16

    key = jax.random.PRNGKey(0)
    kx, kp = jax.random.split(key)
    x = jax.random.normal(kx, (B, INP, H, W), jnp.float32)
    params = init_params(kp, inp=INP, hidden_dim=HID, oup=OUP, kernel_size=K, use_se=USE_SE)

    out = inverted_residual_forward(x, params, inp=INP, hidden_dim=HID, oup=OUP,
                                    kernel_size=K, stride=STRIDE, use_se=USE_SE, use_hs=USE_HS)
    out = jax.block_until_ready(out)
    assert out.shape == (B, OUP, H, W)
    assert bool(jnp.all(jnp.isfinite(out)))

    ref = inverted_residual_ref(x, params, inp=INP, hidden_dim=HID, oup=OUP,
                                kernel_size=K, stride=STRIDE, use_se=USE_SE, use_hs=USE_HS)
    ref = jax.block_until_ready(ref)
    # Both kernel and reference use bf16 matmul operands with f32 accumulation, so only
    # accumulation-order noise remains.
    np.testing.assert_allclose(np.asarray(out), np.asarray(ref), atol=2e-2, rtol=2e-2)
    print("KERNEL_OK")
</pallas_src>

<mosaic_0001>
module attributes {stable_mosaic.version = 11 : i64} {
  func.func @kernel(%arg0: i32, %arg1: memref<1x32x256xf32, #tpu.memory_space<vmem>>, %arg2: memref<1x256xi32, #tpu.memory_space<vmem>>, %arg3: memref<1x256xi32, #tpu.memory_space<vmem>>, %arg4: memref<64x32xbf16, #tpu.memory_space<vmem>>, %arg5: memref<64x1xf32, #tpu.memory_space<vmem>>, %arg6: memref<64x1xf32, #tpu.memory_space<vmem>>, %arg7: memref<64x9xf32, #tpu.memory_space<vmem>>, %arg8: memref<64x1xf32, #tpu.memory_space<vmem>>, %arg9: memref<64x1xf32, #tpu.memory_space<vmem>>, %arg10: memref<16x64xbf16, #tpu.memory_space<vmem>>, %arg11: memref<16x1xf32, #tpu.memory_space<vmem>>, %arg12: memref<64x16xbf16, #tpu.memory_space<vmem>>, %arg13: memref<64x1xf32, #tpu.memory_space<vmem>>, %arg14: memref<32x64xbf16, #tpu.memory_space<vmem>>, %arg15: memref<32x1xf32, #tpu.memory_space<vmem>>, %arg16: memref<32x1xf32, #tpu.memory_space<vmem>>, %arg17: memref<1x32x256xf32, #tpu.memory_space<vmem>>) attributes {dimension_semantics = [#tpu.dimension_semantics<parallel>], iteration_bounds = array<i64: 2>, scalar_prefetch = 0 : i64, scratch_operands = 0 : i64, tpu.core_type = #tpu.core_type<tc>, window_params = [{transform_indices = @transform_0, window_bounds = array<i64: 1, 32, 256>}, {pipeline_mode = #tpu.pipeline_mode<synchronous>, transform_indices = @transform_1, window_bounds = array<i64: 1, 256>}, {pipeline_mode = #tpu.pipeline_mode<synchronous>, transform_indices = @transform_2, window_bounds = array<i64: 1, 256>}, {pipeline_mode = #tpu.pipeline_mode<synchronous>, transform_indices = @transform_3, window_bounds = array<i64: 64, 32>}, {pipeline_mode = #tpu.pipeline_mode<synchronous>, transform_indices = @transform_4, window_bounds = array<i64: 64, 1>}, {pipeline_mode = #tpu.pipeline_mode<synchronous>, transform_indices = @transform_5, window_bounds = array<i64: 64, 1>}, {pipeline_mode = #tpu.pipeline_mode<synchronous>, transform_indices = @transform_6, window_bounds = array<i64: 64, 9>}, {pipeline_mode = #tpu.pipeline_mode<synchronous>, transform_indices = @transform_7, window_bounds = array<i64: 64, 1>}, {pipeline_mode = #tpu.pipeline_mode<synchronous>, transform_indices = @transform_8, window_bounds = array<i64: 64, 1>}, {pipeline_mode = #tpu.pipeline_mode<synchronous>, transform_indices = @transform_9, window_bounds = array<i64: 16, 64>}, {pipeline_mode = #tpu.pipeline_mode<synchronous>, transform_indices = @transform_10, window_bounds = array<i64: 16, 1>}, {pipeline_mode = #tpu.pipeline_mode<synchronous>, transform_indices = @transform_11, window_bounds = array<i64: 64, 16>}, {pipeline_mode = #tpu.pipeline_mode<synchronous>, transform_indices = @transform_12, window_bounds = array<i64: 64, 1>}, {pipeline_mode = #tpu.pipeline_mode<synchronous>, transform_indices = @transform_13, window_bounds = array<i64: 32, 64>}, {pipeline_mode = #tpu.pipeline_mode<synchronous>, transform_indices = @transform_14, window_bounds = array<i64: 32, 1>}, {pipeline_mode = #tpu.pipeline_mode<synchronous>, transform_indices = @transform_15, window_bounds = array<i64: 32, 1>}, {transform_indices = @transform_16, window_bounds = array<i64: 1, 32, 256>}]} {
    %c0 = arith.constant 0 : index
    %c0_0 = arith.constant 0 : index
    %0 = vector.load %arg2[%c0, %c0_0] : memref<1x256xi32, #tpu.memory_space<vmem>>, vector<1x256xi32>
    %c0_1 = arith.constant 0 : index
    %c0_2 = arith.constant 0 : index
    %1 = vector.load %arg3[%c0_1, %c0_2] : memref<1x256xi32, #tpu.memory_space<vmem>>, vector<1x256xi32>
    %c0_3 = arith.constant 0 : index
    %c0_4 = arith.constant 0 : index
    %2 = vector.load %arg4[%c0_3, %c0_4] : memref<64x32xbf16, #tpu.memory_space<vmem>>, vector<64x32xbf16>
    %c0_5 = arith.constant 0 : index
    %c0_6 = arith.constant 0 : index
    %c0_7 = arith.constant 0 : index
    %3 = vector.load %arg1[%c0_5, %c0_6, %c0_7] : memref<1x32x256xf32, #tpu.memory_space<vmem>>, vector<1x32x256xf32>
    %4 = vector.shape_cast %3 : vector<1x32x256xf32> to vector<32x256xf32>
    %5 = arith.truncf %4 : vector<32x256xf32> to vector<32x256xbf16>
    %cst = arith.constant dense<0.000000e+00> : vector<64x256xf32>
    %6 = tpu.matmul %2, %5, %cst {dimension_numbers = #tpu.dot_dimension_numbers<[1], [0], [0], [1], [0, 0, 1, 1], [], []>} : vector<64x32xbf16>, vector<32x256xbf16>, vector<64x256xf32> -> vector<64x256xf32>
    %c0_8 = arith.constant 0 : index
    %c0_9 = arith.constant 0 : index
    %7 = vector.load %arg5[%c0_8, %c0_9] : memref<64x1xf32, #tpu.memory_space<vmem>>, vector<64x1xf32>
    %8 = vector.broadcast %7 : vector<64x1xf32> to vector<64x256xf32>
    %9 = arith.mulf %6, %8 : vector<64x256xf32>
    %c0_10 = arith.constant 0 : index
    %c0_11 = arith.constant 0 : index
    %10 = vector.load %arg6[%c0_10, %c0_11] : memref<64x1xf32, #tpu.memory_space<vmem>>, vector<64x1xf32>
    %11 = vector.broadcast %10 : vector<64x1xf32> to vector<64x256xf32>
    %12 = arith.addf %9, %11 : vector<64x256xf32>
    %cst_12 = arith.constant 3.000000e+00 : f32
    %13 = vector.broadcast %cst_12 : f32 to vector<64x256xf32>
    %14 = arith.addf %12, %13 : vector<64x256xf32>
    %cst_13 = arith.constant 0.000000e+00 : f32
    %cst_14 = arith.constant 6.000000e+00 : f32
    %15 = vector.broadcast %cst_13 : f32 to vector<64x256xf32>
    %16 = arith.maximumf %15, %14 : vector<64x256xf32>
    %17 = vector.broadcast %cst_14 : f32 to vector<64x256xf32>
    %18 = arith.minimumf %17, %16 : vector<64x256xf32>
    %cst_15 = arith.constant 0.166666672 : f32
    %19 = vector.broadcast %cst_15 : f32 to vector<64x256xf32>
    %20 = arith.mulf %18, %19 : vector<64x256xf32>
    %21 = arith.mulf %12, %20 : vector<64x256xf32>
    %c0_16 = arith.constant 0 : index
    %c0_17 = arith.constant 0 : index
    %22 = vector.load %arg7[%c0_16, %c0_17] : memref<64x9xf32, #tpu.memory_space<vmem>>, vector<64x9xf32>
    %c1_i32 = arith.constant 1 : i32
    %23 = tpu.dynamic_rotate %21 by %c1_i32 dim 1 : vector<64x256xf32>, i32 -> vector<64x256xf32>
    %c1_i32_18 = arith.constant 1 : i32
    %24 = vector.broadcast %c1_i32_18 : i32 to vector<1x256xi32>
    %25 = arith.cmpi sge, %1, %24 : vector<1x256xi32>
    %cst_19 = arith.constant 0.000000e+00 : f32
    %26 = vector.shape_cast %25 : vector<1x256xi1> to vector<1x256xi1>
    %27 = vector.broadcast %26 : vector<1x256xi1> to vector<64x256xi1>
    %28 = vector.broadcast %cst_19 : f32 to vector<64x256xf32>
    %29 = arith.select %27, %23, %28 : vector<64x256xi1>, vector<64x256xf32>
    %c255_i32 = arith.constant 255 : i32
    %30 = tpu.dynamic_rotate %21 by %c255_i32 dim 1 : vector<64x256xf32>, i32 -> vector<64x256xf32>
    %c15_i32 = arith.constant 15 : i32
    %31 = vector.broadcast %c15_i32 : i32 to vector<1x256xi32>
    %32 = arith.cmpi slt, %1, %31 : vector<1x256xi32>
    %cst_20 = arith.constant 0.000000e+00 : f32
    %33 = vector.shape_cast %32 : vector<1x256xi1> to vector<1x256xi1>
    %34 = vector.broadcast %33 : vector<1x256xi1> to vector<64x256xi1>
    %35 = vector.broadcast %cst_20 : f32 to vector<64x256xf32>
    %36 = arith.select %34, %30, %35 : vector<64x256xi1>, vector<64x256xf32>
    %37 = vector.extract_strided_slice %22 {offsets = [0, 0], sizes = [64, 1], strides = [1, 1]} : vector<64x9xf32> to vector<64x1xf32>
    %38 = vector.broadcast %37 : vector<64x1xf32> to vector<64x256xf32>
    %39 = arith.mulf %38, %29 : vector<64x256xf32>
    %40 = vector.extract_strided_slice %22 {offsets = [0, 1], sizes = [64, 1], strides = [1, 1]} : vector<64x9xf32> to vector<64x1xf32>
    %41 = vector.broadcast %40 : vector<64x1xf32> to vector<64x256xf32>
    %42 = arith.mulf %41, %21 : vector<64x256xf32>
    %43 = arith.addf %39, %42 : vector<64x256xf32>
    %44 = vector.extract_strided_slice %22 {offsets = [0, 2], sizes = [64, 1], strides = [1, 1]} : vector<64x9xf32> to vector<64x1xf32>
    %45 = vector.broadcast %44 : vector<64x1xf32> to vector<64x256xf32>
    %46 = arith.mulf %45, %36 : vector<64x256xf32>
    %47 = arith.addf %43, %46 : vector<64x256xf32>
    %c16_i32 = arith.constant 16 : i32
    %48 = tpu.dynamic_rotate %47 by %c16_i32 dim 1 : vector<64x256xf32>, i32 -> vector<64x256xf32>
    %c1_i32_21 = arith.constant 1 : i32
    %49 = vector.broadcast %c1_i32_21 : i32 to vector<1x256xi32>
    %50 = arith.cmpi sge, %0, %49 : vector<1x256xi32>
    %cst_22 = arith.constant 0.000000e+00 : f32
    %51 = vector.shape_cast %50 : vector<1x256xi1> to vector<1x256xi1>
    %52 = vector.broadcast %51 : vector<1x256xi1> to vector<64x256xi1>
    %53 = vector.broadcast %cst_22 : f32 to vector<64x256xf32>
    %54 = arith.select %52, %48, %53 : vector<64x256xi1>, vector<64x256xf32>
    %55 = vector.extract_strided_slice %22 {offsets = [0, 3], sizes = [64, 1], strides = [1, 1]} : vector<64x9xf32> to vector<64x1xf32>
    %56 = vector.broadcast %55 : vector<64x1xf32> to vector<64x256xf32>
    %57 = arith.mulf %56, %29 : vector<64x256xf32>
    %58 = vector.extract_strided_slice %22 {offsets = [0, 4], sizes = [64, 1], strides = [1, 1]} : vector<64x9xf32> to vector<64x1xf32>
    %59 = vector.broadcast %58 : vector<64x1xf32> to vector<64x256xf32>
    %60 = arith.mulf %59, %21 : vector<64x256xf32>
    %61 = arith.addf %57, %60 : vector<64x256xf32>
    %62 = vector.extract_strided_slice %22 {offsets = [0, 5], sizes = [64, 1], strides = [1, 1]} : vector<64x9xf32> to vector<64x1xf32>
    %63 = vector.broadcast %62 : vector<64x1xf32> to vector<64x256xf32>
    %64 = arith.mulf %63, %36 : vector<64x256xf32>
    %65 = arith.addf %61, %64 : vector<64x256xf32>
    %66 = arith.addf %54, %65 : vector<64x256xf32>
    %67 = vector.extract_strided_slice %22 {offsets = [0, 6], sizes = [64, 1], strides = [1, 1]} : vector<64x9xf32> to vector<64x1xf32>
    %68 = vector.broadcast %67 : vector<64x1xf32> to vector<64x256xf32>
    %69 = arith.mulf %68, %29 : vector<64x256xf32>
    %70 = vector.extract_strided_slice %22 {offsets = [0, 7], sizes = [64, 1], strides = [1, 1]} : vector<64x9xf32> to vector<64x1xf32>
    %71 = vector.broadcast %70 : vector<64x1xf32> to vector<64x256xf32>
    %72 = arith.mulf %71, %21 : vector<64x256xf32>
    %73 = arith.addf %69, %72 : vector<64x256xf32>
    %74 = vector.extract_strided_slice %22 {offsets = [0, 8], sizes = [64, 1], strides = [1, 1]} : vector<64x9xf32> to vector<64x1xf32>
    %75 = vector.broadcast %74 : vector<64x1xf32> to vector<64x256xf32>
    %76 = arith.mulf %75, %36 : vector<64x256xf32>
    %77 = arith.addf %73, %76 : vector<64x256xf32>
    %c240_i32 = arith.constant 240 : i32
    %78 = tpu.dynamic_rotate %77 by %c240_i32 dim 1 : vector<64x256xf32>, i32 -> vector<64x256xf32>
    %c15_i32_23 = arith.constant 15 : i32
    %79 = vector.broadcast %c15_i32_23 : i32 to vector<1x256xi32>
    %80 = arith.cmpi slt, %0, %79 : vector<1x256xi32>
    %cst_24 = arith.constant 0.000000e+00 : f32
    %81 = vector.shape_cast %80 : vector<1x256xi1> to vector<1x256xi1>
    %82 = vector.broadcast %81 : vector<1x256xi1> to vector<64x256xi1>
    %83 = vector.broadcast %cst_24 : f32 to vector<64x256xf32>
    %84 = arith.select %82, %78, %83 : vector<64x256xi1>, vector<64x256xf32>
    %85 = arith.addf %66, %84 : vector<64x256xf32>
    %c0_25 = arith.constant 0 : index
    %c0_26 = arith.constant 0 : index
    %86 = vector.load %arg8[%c0_25, %c0_26] : memref<64x1xf32, #tpu.memory_space<vmem>>, vector<64x1xf32>
    %87 = vector.broadcast %86 : vector<64x1xf32> to vector<64x256xf32>
    %88 = arith.mulf %85, %87 : vector<64x256xf32>
    %c0_27 = arith.constant 0 : index
    %c0_28 = arith.constant 0 : index
    %89 = vector.load %arg9[%c0_27, %c0_28] : memref<64x1xf32, #tpu.memory_space<vmem>>, vector<64x1xf32>
    %90 = vector.broadcast %89 : vector<64x1xf32> to vector<64x256xf32>
    %91 = arith.addf %88, %90 : vector<64x256xf32>
    %cst_29 = arith.constant dense<0.000000e+00> : vector<64xf32>
    %92 = vector.multi_reduction <add>, %91, %cst_29 [1] : vector<64x256xf32> to vector<64xf32>
    %93 = vector.shape_cast %92 : vector<64xf32> to vector<64x1xf32>
    %cst_30 = arith.constant 3.906250e-03 : f32
    %94 = vector.broadcast %cst_30 : f32 to vector<64x1xf32>
    %95 = arith.mulf %93, %94 : vector<64x1xf32>
    %96 = vector.shape_cast %95 : vector<64x1xf32> to vector<64x1xf32>
    %97 = vector.broadcast %96 : vector<64x1xf32> to vector<64x128xf32>
    %98 = arith.truncf %97 : vector<64x128xf32> to vector<64x128xbf16>
    %c0_31 = arith.constant 0 : index
    %c0_32 = arith.constant 0 : index
    %99 = vector.load %arg10[%c0_31, %c0_32] : memref<16x64xbf16, #tpu.memory_space<vmem>>, vector<16x64xbf16>
    %cst_33 = arith.constant dense<0.000000e+00> : vector<16x128xf32>
    %100 = tpu.matmul %99, %98, %cst_33 {dimension_numbers = #tpu.dot_dimension_numbers<[1], [0], [0], [1], [0, 0, 1, 1], [], []>} : vector<16x64xbf16>, vector<64x128xbf16>, vector<16x128xf32> -> vector<16x128xf32>
    %c0_34 = arith.constant 0 : index
    %c0_35 = arith.constant 0 : index
    %101 = vector.load %arg11[%c0_34, %c0_35] : memref<16x1xf32, #tpu.memory_space<vmem>>, vector<16x1xf32>
    %102 = vector.broadcast %101 : vector<16x1xf32> to vector<16x128xf32>
    %103 = arith.addf %100, %102 : vector<16x128xf32>
    %cst_36 = arith.constant 0.000000e+00 : f32
    %104 = vector.broadcast %cst_36 : f32 to vector<16x128xf32>
    %105 = arith.maximumf %103, %104 : vector<16x128xf32>
    %106 = arith.truncf %105 : vector<16x128xf32> to vector<16x128xbf16>
    %c0_37 = arith.constant 0 : index
    %c0_38 = arith.constant 0 : index
    %107 = vector.load %arg12[%c0_37, %c0_38] : memref<64x16xbf16, #tpu.memory_space<vmem>>, vector<64x16xbf16>
    %cst_39 = arith.constant dense<0.000000e+00> : vector<64x128xf32>
    %108 = tpu.matmul %107, %106, %cst_39 {dimension_numbers = #tpu.dot_dimension_numbers<[1], [0], [0], [1], [0, 0, 1, 1], [], []>} : vector<64x16xbf16>, vector<16x128xbf16>, vector<64x128xf32> -> vector<64x128xf32>
    %c0_40 = arith.constant 0 : index
    %c0_41 = arith.constant 0 : index
    %109 = vector.load %arg13[%c0_40, %c0_41] : memref<64x1xf32, #tpu.memory_space<vmem>>, vector<64x1xf32>
    %110 = vector.broadcast %109 : vector<64x1xf32> to vector<64x128xf32>
    %111 = arith.addf %108, %110 : vector<64x128xf32>
    %cst_42 = arith.constant 3.000000e+00 : f32
    %112 = vector.broadcast %cst_42 : f32 to vector<64x128xf32>
    %113 = arith.addf %111, %112 : vector<64x128xf32>
    %cst_43 = arith.constant 0.000000e+00 : f32
    %cst_44 = arith.constant 6.000000e+00 : f32
    %114 = vector.broadcast %cst_43 : f32 to vector<64x128xf32>
    %115 = arith.maximumf %114, %113 : vector<64x128xf32>
    %116 = vector.broadcast %cst_44 : f32 to vector<64x128xf32>
    %117 = arith.minimumf %116, %115 : vector<64x128xf32>
    %cst_45 = arith.constant 0.166666672 : f32
    %118 = vector.broadcast %cst_45 : f32 to vector<64x128xf32>
    %119 = arith.mulf %117, %118 : vector<64x128xf32>
    %120 = vector.extract_strided_slice %119 {offsets = [0, 0], sizes = [64, 1], strides = [1, 1]} : vector<64x128xf32> to vector<64x1xf32>
    %121 = vector.broadcast %120 : vector<64x1xf32> to vector<64x256xf32>
    %122 = arith.mulf %91, %121 : vector<64x256xf32>
    %cst_46 = arith.constant 3.000000e+00 : f32
    %123 = vector.broadcast %cst_46 : f32 to vector<64x256xf32>
    %124 = arith.addf %122, %123 : vector<64x256xf32>
    %cst_47 = arith.constant 0.000000e+00 : f32
    %cst_48 = arith.constant 6.000000e+00 : f32
    %125 = vector.broadcast %cst_47 : f32 to vector<64x256xf32>
    %126 = arith.maximumf %125, %124 : vector<64x256xf32>
    %127 = vector.broadcast %cst_48 : f32 to vector<64x256xf32>
    %128 = arith.minimumf %127, %126 : vector<64x256xf32>
    %cst_49 = arith.constant 0.166666672 : f32
    %129 = vector.broadcast %cst_49 : f32 to vector<64x256xf32>
    %130 = arith.mulf %128, %129 : vector<64x256xf32>
    %131 = arith.mulf %122, %130 : vector<64x256xf32>
    %c0_50 = arith.constant 0 : index
    %c0_51 = arith.constant 0 : index
    %132 = vector.load %arg14[%c0_50, %c0_51] : memref<32x64xbf16, #tpu.memory_space<vmem>>, vector<32x64xbf16>
    %133 = arith.truncf %131 : vector<64x256xf32> to vector<64x256xbf16>
    %cst_52 = arith.constant dense<0.000000e+00> : vector<32x256xf32>
    %134 = tpu.matmul %132, %133, %cst_52 {dimension_numbers = #tpu.dot_dimension_numbers<[1], [0], [0], [1], [0, 0, 1, 1], [], []>} : vector<32x64xbf16>, vector<64x256xbf16>, vector<32x256xf32> -> vector<32x256xf32>
    %c0_53 = arith.constant 0 : index
    %c0_54 = arith.constant 0 : index
    %135 = vector.load %arg15[%c0_53, %c0_54] : memref<32x1xf32, #tpu.memory_space<vmem>>, vector<32x1xf32>
    %136 = vector.broadcast %135 : vector<32x1xf32> to vector<32x256xf32>
    %137 = arith.mulf %134, %136 : vector<32x256xf32>
    %c0_55 = arith.constant 0 : index
    %c0_56 = arith.constant 0 : index
    %138 = vector.load %arg16[%c0_55, %c0_56] : memref<32x1xf32, #tpu.memory_space<vmem>>, vector<32x1xf32>
    %139 = vector.broadcast %138 : vector<32x1xf32> to vector<32x256xf32>
    %140 = arith.addf %137, %139 : vector<32x256xf32>
    %c0_57 = arith.constant 0 : index
    %c0_58 = arith.constant 0 : index
    %c0_59 = arith.constant 0 : index
    %141 = vector.load %arg1[%c0_57, %c0_58, %c0_59] : memref<1x32x256xf32, #tpu.memory_space<vmem>>, vector<1x32x256xf32>
    %142 = vector.shape_cast %141 : vector<1x32x256xf32> to vector<32x256xf32>
    %143 = arith.addf %140, %142 : vector<32x256xf32>
    %c0_60 = arith.constant 0 : index
    %c0_61 = arith.constant 0 : index
    %c0_62 = arith.constant 0 : index
    %144 = vector.load %arg17[%c0_60, %c0_61, %c0_62] : memref<1x32x256xf32, #tpu.memory_space<vmem>>, vector<1x32x256xf32>
    %145 = vector.shape_cast %144 : vector<1x32x256xf32> to vector<32x256xf32>
    %146 = vector.shape_cast %143 : vector<32x256xf32> to vector<1x32x256xf32>
    tpu.vector_store %arg17[%c0_60, %c0_61, %c0_62], %146 {strides = array<i32>} : memref<1x32x256xf32, #tpu.memory_space<vmem>>, vector<1x32x256xf32>,
    return
  }
  func.func @transform_0(%arg0: i32) -> (i32, i32, i32) {
    %c0_i32 = arith.constant 0 : i32
    %c0_i32_0 = arith.constant 0 : i32
    %c0_i32_1 = arith.constant 0 : i32
    return %arg0, %c0_i32, %c0_i32_0 : i32, i32, i32
  }
  func.func @transform_1(%arg0: i32) -> (i32, i32) {
    %c0_i32 = arith.constant 0 : i32
    %c0_i32_0 = arith.constant 0 : i32
    %c0_i32_1 = arith.constant 0 : i32
    return %c0_i32, %c0_i32_0 : i32, i32
  }
  func.func @transform_2(%arg0: i32) -> (i32, i32) {
    %c0_i32 = arith.constant 0 : i32
    %c0_i32_0 = arith.constant 0 : i32
    %c0_i32_1 = arith.constant 0 : i32
    return %c0_i32, %c0_i32_0 : i32, i32
  }
  func.func @transform_3(%arg0: i32) -> (i32, i32) {
    %c0_i32 = arith.constant 0 : i32
    %c0_i32_0 = arith.constant 0 : i32
    %c0_i32_1 = arith.constant 0 : i32
    return %c0_i32, %c0_i32_0 : i32, i32
  }
  func.func @transform_4(%arg0: i32) -> (i32, i32) {
    %c0_i32 = arith.constant 0 : i32
    %c0_i32_0 = arith.constant 0 : i32
    %c0_i32_1 = arith.constant 0 : i32
    return %c0_i32, %c0_i32_0 : i32, i32
  }
  func.func @transform_5(%arg0: i32) -> (i32, i32) {
    %c0_i32 = arith.constant 0 : i32
    %c0_i32_0 = arith.constant 0 : i32
    %c0_i32_1 = arith.constant 0 : i32
    return %c0_i32, %c0_i32_0 : i32, i32
  }
  func.func @transform_6(%arg0: i32) -> (i32, i32) {
    %c0_i32 = arith.constant 0 : i32
    %c0_i32_0 = arith.constant 0 : i32
    %c0_i32_1 = arith.constant 0 : i32
    return %c0_i32, %c0_i32_0 : i32, i32
  }
  func.func @transform_7(%arg0: i32) -> (i32, i32) {
    %c0_i32 = arith.constant 0 : i32
    %c0_i32_0 = arith.constant 0 : i32
    %c0_i32_1 = arith.constant 0 : i32
    return %c0_i32, %c0_i32_0 : i32, i32
  }
  func.func @transform_8(%arg0: i32) -> (i32, i32) {
    %c0_i32 = arith.constant 0 : i32
    %c0_i32_0 = arith.constant 0 : i32
    %c0_i32_1 = arith.constant 0 : i32
    return %c0_i32, %c0_i32_0 : i32, i32
  }
  func.func @transform_9(%arg0: i32) -> (i32, i32) {
    %c0_i32 = arith.constant 0 : i32
    %c0_i32_0 = arith.constant 0 : i32
    %c0_i32_1 = arith.constant 0 : i32
    return %c0_i32, %c0_i32_0 : i32, i32
  }
  func.func @transform_10(%arg0: i32) -> (i32, i32) {
    %c0_i32 = arith.constant 0 : i32
    %c0_i32_0 = arith.constant 0 : i32
    %c0_i32_1 = arith.constant 0 : i32
    return %c0_i32, %c0_i32_0 : i32, i32
  }
  func.func @transform_11(%arg0: i32) -> (i32, i32) {
    %c0_i32 = arith.constant 0 : i32
    %c0_i32_0 = arith.constant 0 : i32
    %c0_i32_1 = arith.constant 0 : i32
    return %c0_i32, %c0_i32_0 : i32, i32
  }
  func.func @transform_12(%arg0: i32) -> (i32, i32) {
    %c0_i32 = arith.constant 0 : i32
    %c0_i32_0 = arith.constant 0 : i32
    %c0_i32_1 = arith.constant 0 : i32
    return %c0_i32, %c0_i32_0 : i32, i32
  }
  func.func @transform_13(%arg0: i32) -> (i32, i32) {
    %c0_i32 = arith.constant 0 : i32
    %c0_i32_0 = arith.constant 0 : i32
    %c0_i32_1 = arith.constant 0 : i32
    return %c0_i32, %c0_i32_0 : i32, i32
  }
  func.func @transform_14(%arg0: i32) -> (i32, i32) {
    %c0_i32 = arith.constant 0 : i32
    %c0_i32_0 = arith.constant 0 : i32
    %c0_i32_1 = arith.constant 0 : i32
    return %c0_i32, %c0_i32_0 : i32, i32
  }
  func.func @transform_15(%arg0: i32) -> (i32, i32) {
    %c0_i32 = arith.constant 0 : i32
    %c0_i32_0 = arith.constant 0 : i32
    %c0_i32_1 = arith.constant 0 : i32
    return %c0_i32, %c0_i32_0 : i32, i32
  }
  func.func @transform_16(%arg0: i32) -> (i32, i32, i32) {
    %c0_i32 = arith.constant 0 : i32
    %c0_i32_0 = arith.constant 0 : i32
    %c0_i32_1 = arith.constant 0 : i32
    return %arg0, %c0_i32, %c0_i32_0 : i32, i32, i32
  }
}

</mosaic_0001>

<bundles_post_ra>
// kernel: tpu_custom_call.1
= control target key start
LH: loop header
LB: loop body
LE: loop exit
PB: predicated region body
PF: predicated region fallthrough
CT: control target
= control target key end

     0   :  { %s4537_s0 = inlined_call_operand.vmem [shape: f32[2,32,256], index: 0, kind: input, shape index: {}]   ;;  %s4538_s1 = inlined_call_operand.vmem [shape: s32[1,256], index: 1, kind: input, shape index: {}]   ;;  %s4539_s2 = inlined_call_operand.vmem [shape: s32[1,256], index: 2, kind: input, shape index: {}]   ;;  %s4540_s3 = inlined_call_operand.vmem [shape: bf16[64,32], index: 3, kind: input, shape index: {}]   ;;  %s4541_s4 = inlined_call_operand.vmem [shape: f32[64,1], index: 4, kind: input, shape index: {}]   ;;  %s4542_s5 = inlined_call_operand.vmem [shape: f32[64,1], index: 5, kind: input, shape index: {}]   ;;  %s4543_s6 = inlined_call_operand.vmem [shape: f32[64,9], index: 6, kind: input, shape index: {}]   ;;  %s4544_s7 = inlined_call_operand.vmem [shape: f32[64,1], index: 7, kind: input, shape index: {}]   ;;  %s4545_s8 = inlined_call_operand.vmem [shape: f32[64,1], index: 8, kind: input, shape index: {}]   ;;  %s4546_s9 = inlined_call_operand.vmem [shape: bf16[16,64], index: 9, kind: input, shape index: {}]   ;;  %s4547_s10 = inlined_call_operand.vmem [shape: f32[16,1], index: 10, kind: input, shape index: {}]   ;;  %s4548_s11 = inlined_call_operand.vmem [shape: bf16[64,16], index: 11, kind: input, shape index: {}]   ;;  %s4549_s12 = inlined_call_operand.vmem [shape: f32[64,1], index: 12, kind: input, shape index: {}]   ;;  %s4550_s13 = inlined_call_operand.vmem [shape: bf16[32,64], index: 13, kind: input, shape index: {}]   ;;  %s4551_s14 = inlined_call_operand.vmem [shape: f32[32,1], index: 14, kind: input, shape index: {}]   ;;  %s4552_s15 = inlined_call_operand.vmem [shape: f32[32,1], index: 15, kind: input, shape index: {}]   ;;  %s4553_s16 = inlined_call_operand.hbm [shape: f32[2,32,256], index: 16, kind: output, shape index: {}]  }
   0x1   :  { %4638 = sst [smem:[#allocation80_spill]] %s4537_s0 }
   0x2   :  { %21 = vsyncpa [#allocation3], 0 }
   0x3   :  { %23 = vsyncpa [#allocation3 + $0x1], 0  ;;  %s2891_s21 = smov 0   ;;  %s2893_s22 = smov 0  }
   0x4   :  { %s2895_s23 = smov 0   ;;  %s2897_s24 = smov 0  }
   0x5 LB: > { %4639 = sst [smem:[#allocation5_spill]] %s2775_s21  ;;  %s2912_s25 = sadd.s32 4294967295, %s2787_s24   ;;  %s2787_s24 = sphi %s2897_s24, %s4814_s24   ;;  %s2783_s23 = sphi %s2895_s23, %s4816_s23   ;;  %s2779_s22 = sphi %s2893_s22, %s4818_s22   ;;  %s2775_s21 = sphi %s2891_s21, %s4817_s21  }
   0x6   : > { %4640 = sst [smem:[#allocation6_spill]] %s2783_s23  ;;  %s2533_s26 = sadd.s32 4294967294, %s2787_s24  }
   0x7   : > { %s2916_s27 = sadd.s32 1, %s2787_s24   ;;  %s377_s28 = sadd.s32 1, %s2783_s23 }
   0x8   : > { %4641 = sst [smem:[#allocation7_spill]] %s2916_s27  ;;  %s374_s29 = ssub.s32 %s2787_s24, %s2916_s27 }
   0x9   : > { %p387_p0 = scmp.ne.s32.totalorder %s2783_s23, %s2779_s22  ;;  %p375_p1 = scmp.eq.s32.totalorder %s374_s29, 0 }
   0xa   : > { %p388_p2 = scmp.eq.s32.totalorder %s2912_s25, 1  ;;  %p393_p3 = scmp.ne.s32.totalorder %s2779_s22, %s2775_s21 }
   0xb   : > { %p394_p4 = scmp.eq.s32.totalorder %s2533_s26, 1  ;;  %p2536_p7 = scmp.ge.s32.totalorder %s2787_s24, 1 }
   0xc   : > { %s2927_s30 = scalar_select %p375_p1, %s2783_s23, %s377_s28  }
   0xd   : > { %p2929_p5 = por %p388_p2, %p387_p0  ;;  %p2933_p6 = por %p394_p4, %p393_p3 }
   0xe   : > { %4642 = sst [smem:[#allocation8_spill]] %s2927_s30  ;;  %p465_p8 = scmp.lt.s32.totalorder %s2787_s24, 3 }
   0xf   : > { %s4644_s17 = scalar_select %p2933_p6, 1, 0 }
  0x10   : > { %p466_p9 = pnand %p2536_p7, %p465_p8 }
  0x11   : > { %4645 = sst [smem:[#allocation9_spill]] %s4644_s17 }
  0x12   : > { %469 = sbr.rel (%p466_p9) target bundleno = 1648 (0x670), region = 84 }
  0x17   : > { %v719_v0 = vld [vmem:[%s4542_s5 + $0x30] sm:$0xff]  ;;  %p515_p10 = scmp.lt.s32.totalorder %s2912_s25, 1  ;;  %v4559_v1 = vmov 0   ;;  %v720_v2 = vld [vmem:[%s4542_s5 + $0x38] sm:$0xff]  ;;  %s4646_s30 = sld [smem:[#allocation80_spill]]  ;;  %v654_v3 = vld [vmem:[%s4541_s4 + $0x28] sm:$0xff] }
  0x18   : > { %2661 = vset.pattern.permute.xlu1 %v4559_v1  ;;  %608 = vmatprep.mubr.bf16.mxu0 %v4559_v1  ;;  %v655_v15 = vld [vmem:[%s4541_s4 + $0x30] sm:$0xff]  ;;  %v718_v17 = vld [vmem:[%s4542_s5 + $0x28] sm:$0xff]  ;;  %v2708_v18 = vld [vmem:[%s4540_s3] sm:$0xff]   ;;  %vm563_vm0 = vcmask 261120   ;;  %v2790_v34 = vmov 1   ;;  %v2791_v36 = vmov 2  }
  0x19   : > { %753 = vperm.xlu1 %2661, %v719_v0   ;;  %s516_s20 = scalar_select %p515_p10, %s2912_s25, 1  ;;  %628 = vmatprep.mubr.bf16.mxu1 %v4559_v1  ;;  %v656_v19 = vld [vmem:[%s4541_s4 + $0x38] sm:$0xff]  ;;  %v2709_v20 = vld [vmem:[%s4540_s3 + $0x10] sm:$0xff]   ;;  %v653_v22 = vld [vmem:[%s4541_s4 + $0x20] sm:$0xff]  ;;  %v2792_v37 = vmov 6   ;;  %v2793_v40 = vmov 7  }
  0x1a   : > { %2660 = vset.pattern.permute.xlu0 %v4559_v1  ;;  %v652_v21 = vld [vmem:[%s4541_s4 + $0x18] sm:$0xff]  ;;  %v2710_v24 = vld [vmem:[%s4540_s3 + $0x8] sm:$0xff]   ;;  %v717_v25 = vld [vmem:[%s4542_s5 + $0x20] sm:$0xff]  ;;  %v2794_v44 = vmov 8   ;;  %v4563_v46 = vmov 3   ;;  %s2798_s27 = smov 1  }
  0x1b   : > { %s2567_s29 = sshll.u32 %s516_s20, 6  ;;  %689 = vperm.xlu0 %2660, %v655_v15   ;;  %v716_v23 = vld [vmem:[%s4542_s5 + $0x18] sm:$0xff]  ;;  %v650_v27 = vld [vmem:[%s4541_s4 + $0x8] sm:$0xff]  ;;  %v651_v28 = vld [vmem:[%s4541_s4 + $0x10] sm:$0xff]  ;;  %s4637_s26 = smov 16  }
  0x1c   : > { %v2711_v26 = vld [vmem:[%s4540_s3 + $0x18] sm:$0xff]   ;;  %v714_v29 = vld [vmem:[%s4542_s5 + $0x8] sm:$0xff]  ;;  %v715_v30 = vld [vmem:[%s4542_s5 + $0x10] sm:$0xff]  ;;  %s2801_s28 = smov 112   ;;  %s2568_s19 = sshll.u32 %s2912_s25, 10 }
  0x1d   : > { %s2954_s23 = scalar_lea.vmem %s4646_s30, %s2567_s29  ;;  %758 = vperm.xlu1 %2661, %v720_v2   ;;  %v3022_v31 = vld [vmem:[%s4543_s6 + $0x38] sm:$0xff]  ;;  %v649_v32 = vld [vmem:[%s4541_s4] sm:$0xff]  ;;  %v3036_v35 = vld [vmem:[%s4543_s6 + $0x30] sm:$0xff]  ;;  %v4566_v2 = vmov 4   ;;  %s2799_s30 = smov 127  }
  0x1e   : > { %v536_v4 = vld [vmem:[%s2954_s23 + $0x28] sm:$0xff]  ;;  %v538_v5 = vld [vmem:[%s2954_s23 + $0x38] sm:$0xff]  ;;  %v535_v6 = vld [vmem:[%s2954_s23 + $0x20] sm:$0xff]  ;;  %s512_s29 = sand.u32 1, %s2779_s22   ;;  %s2804_s20 = smov [#allocation2]  }
  0x1f   : > { %v542_v7 = vpack.c.bf16 %v538_v5, %v536_v4  ;;  %v537_v8 = vld [vmem:[%s2954_s23 + $0x30] sm:$0xff]  ;;  %v532_v9 = vld [vmem:[%s2954_s23 + $0x8] sm:$0xff]  ;;  %v534_v10 = vld [vmem:[%s2954_s23 + $0x18] sm:$0xff]  ;;  %694 = vperm.xlu0 %2660, %v656_v19   ;;  %v4561_v5 = vmov 5   ;;  %s2537_s18 = sshll.u32 %s512_s29, 6  ;;  %s4496_s25 = scalar_lea.sflag [#allocation3], %s512_s29 }
  0x20   : > { %v541_v11 = vpack.c.bf16 %v537_v8, %v535_v6  ;;  %v540_v12 = vpack.c.bf16 %v534_v10, %v532_v9  ;;  %v531_v13 = vld [vmem:[%s2954_s23] sm:$0xff]  ;;  %v533_v14 = vld [vmem:[%s2954_s23 + $0x10] sm:$0xff]  ;;  %v3050_v38 = vld [vmem:[%s4543_s6 + $0x28] sm:$0xff]  ;;  %s4468_s21 = scalar_lea.vmem [#allocation2], %s2537_s18  ;;  %s2731_s18 = sshll.u32 %s2804_s20, 4  ;;  %s2732_s18 = int_to_ptr.vmem [resolvable:$false] %s2731_s18 }
  0x21   : > { %588 = vmatprep.subr.bf16.mxu0 %v542_v7  ;;  %2601 = vmatprep.subr.bf16.mxu1 %v542_v7  ;;  %v539_v16 = vpack.c.bf16 %v533_v14, %v531_v13  ;;  %v713_v33 = vld [vmem:[%s4542_s5] sm:$0xff]  ;;  %v3056_v39 = vld [vmem:[%s4543_s6 + $0x18] sm:$0xff]  ;;  %v3064_v41 = vld [vmem:[%s4543_s6 + $0x8] sm:$0xff] }
  0x22   : > { %684 = vperm.xlu1 %2661, %v654_v3   ;;  %589 = vmatpush1.bf16.msra.mxu0 %v541_v11  ;;  %v3069_v42 = vld [vmem:[%s4543_s6 + $0x20] sm:$0xff]  ;;  %v3083_v43 = vld [vmem:[%s4543_s6 + $0x10] sm:$0xff] }
  0x23   : > { %2603 = vmatpush1.bf16.msra.mxu1 %v541_v11  ;;  %590 = vmatprep.subr.bf16.mxu0 %v540_v12  ;;  %v3089_v45 = vld [vmem:[%s4543_s6] sm:$0xff] }
  0x24   : > { %2602 = vmatprep.subr.bf16.mxu1 %v540_v12  ;;  %679 = vperm.xlu0 %2660, %v653_v22  }
  0x26   : > { %748 = vperm.xlu1 %2661, %v718_v17   ;;  %591 = vmatpush1.bf16.msra.mxu0 %v539_v16 }
  0x27   : > { %2604 = vmatpush1.bf16.msra.mxu1 %v539_v16 }
  0x28   : > { %743 = vperm.xlu0 %2660, %v717_v25  }
  0x29   : > { %2544 = vmatmul.mubr.msk.bf16.vlgmr.msra.gmra.mxu0 %vm563_vm0, %v2708_v18 }
  0x2a   : > { %2546 = vmatmul.mubr.msk.bf16.vlgmr.msra.gmra.mxu1 %vm563_vm0, %v2709_v20  ;;  %674 = vperm.xlu1 %2661, %v652_v21  }
  0x2b   : > { %618 = vmatprep.mubr.bf16.mxu0 %v4559_v1  ;;  %638 = vmatprep.mubr.bf16.mxu1 %v4559_v1 }
  0x2c   : > { %669 = vperm.xlu0 %2660, %v651_v28  }
  0x2e   : > { %738 = vperm.xlu1 %2661, %v716_v23  }
  0x30   : > { %733 = vperm.xlu0 %2660, %v715_v30  }
  0x31   : > { %2545 = vmatmul.mubr.msk.bf16.gmra.mxu0 %vm563_vm0, %v2710_v24 }
  0x32   : > { %2547 = vmatmul.mubr.msk.bf16.gmra.mxu1 %vm563_vm0, %v2711_v26  ;;  %664 = vperm.xlu1 %2661, %v650_v27  }
  0x33   : > { %2356 = vmatprep.mubr.bf16.mxu0 %v4559_v1 }
  0x34   : > { %659 = vperm.xlu0 %2660, %v649_v32  }
  0x36   : > { %728 = vperm.xlu1 %2661, %v714_v29  }
  0x38   : > { %723 = vperm.xlu0 %2660, %v713_v33  }
  0x3a   : > { %1058 = vperm.xlu1 %2661, %v3022_v31  }
  0x3c   : > { %2662 = vset.pattern.permute.xlu0 %v2790_v34 }
  0x3d   : > { %1102 = vperm.xlu0 %2662, %v3036_v35  }
  0x3e   : > { %2663 = vset.pattern.permute.xlu1 %v2790_v34 }
  0x3f   : > { %1106 = vperm.xlu1 %2663, %v3022_v31  }
  0x41   : > { %2665 = vset.pattern.permute.xlu0 %v2791_v36 }
  0x42   : > { %1170 = vperm.xlu0 %2665, %v3022_v31  }
  0x43   : > { %2664 = vset.pattern.permute.xlu1 %v2791_v36 }
  0x44   : > { %1166 = vperm.xlu1 %2664, %v3036_v35  }
  0x46   : > { %1162 = vperm.xlu0 %2665, %v3050_v38  }
  0x48   : > { %2666 = vset.pattern.permute.xlu1 %v2792_v37 }
  0x49   : > { %1499 = vperm.xlu1 %2666, %v3036_v35  }
  0x4a   : > { %1154 = vperm.xlu0 %2665, %v3056_v39  }
  0x4d   : > { %1503 = vperm.xlu1 %2666, %v3022_v31  }
  0x4e   : > { %1146 = vperm.xlu0 %2665, %v3064_v41  }
  0x51   : > { %2667 = vset.pattern.permute.xlu1 %v2793_v40 }
  0x52   : > { %1551 = vperm.xlu1 %2667, %v3022_v31   ;;  %2684 = vset.pattern.permute.xlu0 %v2793_v40 }
  0x53   : > { %1547 = vperm.xlu0 %2684, %v3036_v35  }
  0x56   : > { %2668 = vset.pattern.permute.xlu1 %v4559_v1 }
  0x57   : > { %1043 = vperm.xlu1 %2668, %v3069_v42   ;;  %1539 = vperm.xlu0 %2684, %v3069_v42  }
  0x5b   : > { %2669 = vset.pattern.permute.xlu1 %v2790_v34  ;;  %1531 = vperm.xlu0 %2684, %v3083_v43  }
  0x5c   : > { %1094 = vperm.xlu1 %2669, %v3069_v42  }
  0x5f   : > { %1523 = vperm.xlu0 %2684, %v3089_v45  }
  0x60   : > { %1098 = vperm.xlu1 %2669, %v3050_v38  }
  0x63   : > { %2686 = vset.pattern.permute.xlu0 %v2794_v44 }
  0x64   : > { %2670 = vset.pattern.permute.xlu1 %v2794_v44  ;;  %1611 = vperm.xlu0 %2686, %v3036_v35  }
  0x65   : > { %1615 = vperm.xlu1 %2670, %v3022_v31  }
  0x68   : > { %1603 = vperm.xlu0 %2686, %v3069_v42  }
  0x69   : > { %2671 = vset.pattern.permute.xlu1 %v2791_v36 }
  0x6a   : > { %1158 = vperm.xlu1 %2671, %v3069_v42  }
  0x6c   : > { %1595 = vperm.xlu0 %2686, %v3083_v43  }
  0x6e   : > { %2672 = vset.pattern.permute.xlu1 %v2792_v37 }
  0x6f   : > { %1491 = vperm.xlu1 %2672, %v3069_v42  }
  0x70   : > { %1591 = vperm.xlu0 %2686, %v3064_v41  }
  0x73   : > { %1495 = vperm.xlu1 %2672, %v3050_v38  }
  0x74   : > { %2689 = vset.pattern.permute.xlu0 %v4563_v46 }
  0x75   : > { %1307 = vperm.xlu0 %2689, %v3036_v35  }
  0x77   : > { %2673 = vset.pattern.permute.xlu1 %v2793_v40 }
  0x78   : > { %1543 = vperm.xlu1 %2673, %v3050_v38  }
  0x7c   : > { %2674 = vset.pattern.permute.xlu1 %v4559_v1 }
  0x7d   : > { %1033 = vperm.xlu1 %2674, %v3083_v43  }
  0x81   : > { %2675 = vset.pattern.permute.xlu1 %v2790_v34 }
  0x82   : > { %1086 = vperm.xlu1 %2675, %v3083_v43  }
  0x86   : > { %1090 = vperm.xlu1 %2675, %v3056_v39  }
  0x8a   : > { %2676 = vset.pattern.permute.xlu1 %v2794_v44 }
  0x8b   : > { %1607 = vperm.xlu1 %2676, %v3050_v38  }
  0x8f   : > { %2677 = vset.pattern.permute.xlu1 %v2791_v36 }
  0x90   : > { %1150 = vperm.xlu1 %2677, %v3083_v43  }
  0x94   : > { %2678 = vset.pattern.permute.xlu1 %v2792_v37  ;;  %v3116_v47 = vpop.permute.xlu1 %753 }
  0x95   : > { %1483 = vperm.xlu1 %2678, %v3083_v43  }
  0x96   : > { %v3152_v58 = vpop.permute.xlu0 %689 }
  0x98   : > { %v3119_v48 = vpop.permute.xlu1 %758 }
  0x99   : > { %1487 = vperm.xlu1 %2678, %v3056_v39  }
  0x9a   : > { %v3158_v60 = vpop.permute.xlu0 %694 }
  0x9d   : > { %2679 = vset.pattern.permute.xlu1 %v2793_v40  ;;  %v3122_v49 = vpop.permute.xlu1 %684 }
  0x9e   : > { %1535 = vperm.xlu1 %2679, %v3056_v39  }
  0x9f   : > { %v680_v62 = vpop.permute.xlu0 %679 }
  0xa1   : > { %v3125_v50 = vpop.permute.xlu1 %748 }
  0xa2   : > { %2680 = vset.pattern.permute.xlu1 %v4559_v1 }
  0xa3   : > { %1023 = vperm.xlu1 %2680, %v3089_v45   ;;  %v744_v0 = vpop.permute.xlu0 %743 }
  0xa5   : > { %v3129_v51 = vpop.permute.xlu1 %674 }
  0xa7   : > { %2681 = vset.pattern.permute.xlu1 %v2790_v34  ;;  %v3174_v6 = vpop.permute.xlu0 %669 }
  0xa8   : > { %1078 = vperm.xlu1 %2681, %v3089_v45  }
  0xa9   : > { %v3133_v52 = vpop.permute.xlu1 %738 }
  0xab   : > { %v3179_v8 = vpop.permute.xlu0 %733 }
  0xac   : > { %1082 = vperm.xlu1 %2681, %v3064_v41  }
  0xad   : > { %v3136_v53 = vpop.permute.xlu1 %664 }
  0xaf   : > { %v660_v10 = vpop.permute.xlu0 %659 }
  0xb0   : > { %2682 = vset.pattern.permute.xlu1 %v2794_v44 }
  0xb1   : > { %1599 = vperm.xlu1 %2682, %v3056_v39   ;;  %v3139_v54 = vpop.permute.xlu1 %728 }
  0xb3   : > { %v724_v13 = vpop.permute.xlu0 %723 }
  0xb5   : > { %2683 = vset.pattern.permute.xlu1 %v2791_v36  ;;  %v3142_v55 = vpop.permute.xlu1 %1058 }
  0xb6   : > { %4647 = vst [vmem:[#allocation10_spill] sm:$0xff] %v3142_v55  ;;  %1142 = vperm.xlu1 %2683, %v3089_v45  }
  0xba   : > { %2685 = vset.pattern.permute.xlu1 %v2792_v37  ;;  %v3146_v56 = vpop.permute.xlu1 %1106 }
  0xbb   : > { %4648 = vst [vmem:[#allocation11_spill] sm:$0xff] %v3146_v56  ;;  %1475 = vperm.xlu1 %2685, %v3089_v45  }
  0xbf   : > { %1479 = vperm.xlu1 %2685, %v3064_v41   ;;  %v3150_v57 = vpop.permute.xlu1 %1166 }
  0xc3   : > { %2687 = vset.pattern.permute.xlu1 %v2793_v40 }
  0xc4   : > { %1527 = vperm.xlu1 %2687, %v3064_v41   ;;  %v3156_v59 = vpop.permute.xlu1 %1499 }
  0xc8   : > { %2688 = vset.pattern.permute.xlu1 %v2794_v44  ;;  %v3160_v61 = vpop.permute.xlu1 %1503 }
  0xc9   : > { %4649 = vst [vmem:[#allocation12_spill] sm:$0xff] %v3160_v61  ;;  %1587 = vperm.xlu1 %2688, %v3089_v45  }
  0xcd   : > { %2690 = vset.pattern.permute.xlu1 %v4563_v46  ;;  %v3164_v63 = vpop.permute.xlu1 %1551 }
  0xce   : > { %4650 = vst [vmem:[#allocation13_spill] sm:$0xff] %v3164_v63  ;;  %1311 = vperm.xlu1 %2690, %v3022_v31  }
  0xd2   : > { %2691 = vset.pattern.permute.xlu1 %v4566_v2  ;;  %v3168_v3 = vpop.permute.xlu1 %1043 }
  0xd3   : > { %1355 = vperm.xlu1 %2691, %v3036_v35  }
  0xd7   : > { %v3171_v4 = vpop.permute.xlu1 %1094  ;;  %2692 = vset.pattern.permute.xlu1 %v4561_v5 }
  0xd8   : > { %1419 = vperm.xlu1 %2692, %v3036_v35  }
  0xdb   : > { %v3177_v7 = vpop.permute.xlu1 %1098 }
  0xdc   : > { %4651 = vst [vmem:[#allocation14_spill] sm:$0xff] %v3177_v7 }
  0xe0   : > { %v3181_v9 = vpop.permute.xlu1 %1615 }
  0xe1   : > { %4652 = vst [vmem:[#allocation15_spill] sm:$0xff] %v3181_v9 }
  0xe5   : > { %v3183_v11 = vpop.permute.xlu1 %1158 }
  0xe9   : > { %v610_v12 = vpop.f32.mrf.mxu0 }
  0xea   : > { %v697_v14 = vmul.f32 %v660_v10, %v610_v12  ;;  %v630_v15 = vpop.f32.mrf.mxu1  ;;  %v3185_v18 = vpop.permute.xlu1 %1491 }
  0xeb   : > { %v705_v16 = vmul.f32 %v680_v62, %v630_v15  ;;  %v612_v17 = vpop.f32.mrf.mxu0 }
  0xec   : > { %v761_v19 = vadd.f32 %v724_v13, %v697_v14  ;;  %v698_v20 = vmul.f32 %v660_v10, %v612_v17  ;;  %v632_v21 = vpop.f32.mrf.mxu1 }
  0xed   : > { %v769_v22 = vadd.f32 %v744_v0, %v705_v16  ;;  %v614_v23 = vpop.f32.mrf.mxu0  ;;  %v706_v29 = vmul.f32 %v680_v62, %v632_v21 }
  0xee   : > { %v762_v24 = vadd.f32 %v724_v13, %v698_v20  ;;  %v699_v25 = vmul.f32 %v3136_v53, %v614_v23  ;;  %v634_v26 = vpop.f32.mrf.mxu1  ;;  %v777_v27 = vadd.f32 3.0, %v761_v19  ;;  %v3192_v44 = vpop.permute.xlu1 %1495 }
  0xef   : > { %v785_v28 = vadd.f32 3.0, %v769_v22  ;;  %v707_v30 = vmul.f32 %v3122_v49, %v634_v26  ;;  %4653 = vst [vmem:[#allocation16_spill] sm:$0xff] %v3192_v44  ;;  %v770_v14 = vadd.f32 %v744_v0, %v706_v29  ;;  %v616_v23 = vpop.f32.mrf.mxu0 }
  0xf0   : > { %v778_v32 = vadd.f32 3.0, %v762_v24  ;;  %v763_v33 = vadd.f32 %v3139_v54, %v699_v25  ;;  %v636_v34 = vpop.f32.mrf.mxu1  ;;  %v793_v12 = vmax.f32 %v777_v27, 0.0  ;;  %v700_v0 = vmul.f32 %v3136_v53, %v616_v23 }
  0xf1   : > { %v801_v36 = vmax.f32 %v785_v28, 0.0  ;;  %v771_v37 = vadd.f32 %v3125_v50, %v707_v30  ;;  %v708_v40 = vmul.f32 %v3122_v49, %v636_v34  ;;  %v786_v30 = vadd.f32 3.0, %v770_v14 }
  0xf2   : > { %v794_v10 = vmax.f32 %v778_v32, 0.0  ;;  %v779_v62 = vadd.f32 3.0, %v763_v33  ;;  %v809_v26 = vmin.f32 %v793_v12, 6.0 }
  0xf3   : > { %v817_v13 = vmin.f32 %v801_v36, 6.0  ;;  %v787_v15 = vadd.f32 3.0, %v771_v37  ;;  %v772_v17 = vadd.f32 %v3125_v50, %v708_v40  ;;  %v3197_v34 = vpop.permute.xlu1 %1543 }
  0xf4   : > { %v810_v16 = vmin.f32 %v794_v10, 6.0  ;;  %v795_v27 = vmax.f32 %v779_v62, 0.0  ;;  %v825_v50 = vmul.f32 0.16666667, %v809_v26 }
  0xf5   : > { %v833_v20 = vmul.f32 0.16666667, %v817_v13  ;;  %v803_v21 = vmax.f32 %v787_v15, 0.0  ;;  %v788_v29 = vadd.f32 3.0, %v772_v17 }
  0xf6   : > { %v826_v25 = vmul.f32 0.16666667, %v810_v16  ;;  %v811_v40 = vmin.f32 %v795_v27, 6.0  ;;  %v3215_v53 = vmul.f32 %v825_v50, %v761_v19 }
  0xf7   : > { %v3195_v28 = vmul.f32 %v833_v20, %v769_v22  ;;  %v819_v49 = vmin.f32 %v803_v21, 6.0  ;;  %v802_v22 = vmax.f32 %v786_v30, 0.0  ;;  %v804_v12 = vmax.f32 %v788_v29, 0.0  ;;  %v640_v21 = vpop.f32.mrf.mxu1 }
  0xf8   : > { %v3199_v32 = vmul.f32 %v826_v25, %v762_v24  ;;  %v764_v24 = vadd.f32 %v3139_v54, %v700_v0  ;;  %v3209_v13 = vpop.permute.xlu1 %1033  ;;  %4658 = vst [vmem:[#allocation21_spill] sm:$0xff] %v3215_v53  ;;  %v827_v16 = vmul.f32 0.16666667, %v811_v40 }
  0xf9   : > { %4654 = vst [vmem:[#allocation17_spill] sm:$0xff] %v3195_v28  ;;  %v835_v36 = vmul.f32 0.16666667, %v819_v49  ;;  %873 = vrot.lane.b32.xlu1 %v3195_v28, %s2798_s27  ;;  %4657 = vst [vmem:[#allocation20_spill] sm:$0xff] %v3209_v13  ;;  %v818_v15 = vmin.f32 %v802_v22, 6.0  ;;  %v820_v20 = vmin.f32 %v804_v12, 6.0  ;;  %v642_v30 = vpop.f32.mrf.mxu1 }
  0xfa   : > { %4655 = vst [vmem:[#allocation18_spill] sm:$0xff] %v3199_v32  ;;  %960 = vrot.lane.b32.xlu0 %v3199_v32, %s2799_s30  ;;  %v780_v62 = vadd.f32 3.0, %v764_v24  ;;  %v3224_v25 = vmul.f32 %v827_v16, %v763_v33 }
  0xfb   : > { %v3206_v10 = vmul.f32 %v835_v36, %v771_v37  ;;  %v834_v54 = vmul.f32 0.16666667, %v818_v15  ;;  %v709_v37 = vmul.f32 %v3152_v58, %v640_v21  ;;  %v836_v26 = vmul.f32 0.16666667, %v820_v20  ;;  %v620_v36 = vpop.f32.mrf.mxu0  ;;  %v644_v33 = vpop.f32.mrf.mxu1 }
  0xfc   : > { %4659 = vst [vmem:[#allocation22_spill] sm:$0xff] %v3224_v25  ;;  %v796_v19 = vmax.f32 %v780_v62, 0.0  ;;  %v701_v22 = vmul.f32 %v3174_v6, %v620_v36  ;;  %v711_v12 = vmul.f32 %v3158_v60, %v644_v33 }
  0xfd   : > { %4656 = vst [vmem:[#allocation19_spill] sm:$0xff] %v3206_v10  ;;  %952 = vrot.lane.b32.xlu1 %v3195_v28, %s2799_s30  ;;  %v3222_v23 = vpop.permute.xlu1 %1086  ;;  %v3230_v49 = vmul.f32 %v834_v54, %v770_v14  ;;  %v773_v27 = vadd.f32 %v3116_v47, %v709_v37  ;;  %v3233_v29 = vmul.f32 %v836_v26, %v772_v17  ;;  %v622_v17 = vpop.f32.mrf.mxu0 }
  0xfe   : > { %875 = vrot.lane.b32.xlu0 %v3206_v10, %s2798_s27  ;;  %v812_v0 = vmin.f32 %v796_v19, 6.0  ;;  %v765_v16 = vadd.f32 %v3179_v8, %v701_v22  ;;  %v775_v21 = vadd.f32 %v3119_v48, %v711_v12  ;;  %v710_v26 = vmul.f32 %v3152_v58, %v642_v30  ;;  %v646_v58 = vpop.f32.mrf.mxu1 }
  0xff   : > { %4660 = vst [vmem:[#allocation23_spill] sm:$0xff] %v3230_v49  ;;  %4661 = vst [vmem:[#allocation24_spill] sm:$0xff] %v3233_v29  ;;  %v789_v40 = vadd.f32 3.0, %v773_v27  ;;  %v624_v54 = vpop.f32.mrf.mxu0  ;;  %v702_v1 = vmul.f32 %v3174_v6, %v622_v17 }
 0x100   : > { %v828_v14 = vmul.f32 0.16666667, %v812_v0  ;;  %v781_v37 = vadd.f32 3.0, %v765_v16  ;;  %v703_v36 = vmul.f32 %v3129_v51, %v624_v54  ;;  %v791_v33 = vadd.f32 3.0, %v775_v21 }
 0x101   : > { %865 = vrot.lane.b32.xlu1 %v3215_v53, %s2798_s27  ;;  %v3235_v50 = vpop.permute.xlu1 %1090  ;;  %v805_v62 = vmax.f32 %v789_v40, 0.0  ;;  %v774_v40 = vadd.f32 %v3116_v47, %v710_v26  ;;  %v766_v5 = vadd.f32 %v3179_v8, %v702_v1 }
 0x102   : > { %954 = vrot.lane.b32.xlu0 %v3206_v10, %s2799_s30  ;;  %v3250_v20 = vmul.f32 %v828_v14, %v764_v24  ;;  %v797_v24 = vmax.f32 %v781_v37, 0.0  ;;  %v767_v14 = vadd.f32 %v3133_v52, %v703_v36  ;;  %v807_v12 = vmax.f32 %v791_v33, 0.0 }
 0x103   : > { %v821_v19 = vmin.f32 %v805_v62, 6.0  ;;  %v790_v37 = vadd.f32 3.0, %v774_v40  ;;  %v712_v36 = vmul.f32 %v3158_v60, %v646_v58  ;;  %v626_v60 = vpop.f32.mrf.mxu0 }
 0x104   : > { %4663 = vst [vmem:[#allocation26_spill] sm:$0xff] %v3250_v20  ;;  %v813_v30 = vmin.f32 %v797_v24, 6.0  ;;  %v783_v47 = vadd.f32 3.0, %v767_v14  ;;  %v823_v26 = vmin.f32 %v807_v12, 6.0 }
 0x105   : > { %944 = vrot.lane.b32.xlu1 %v3215_v53, %s2799_s30  ;;  %v837_v22 = vmul.f32 0.16666667, %v821_v19  ;;  %v3274_v19 = vpop.permute.xlu0 %1102  ;;  %v806_v24 = vmax.f32 %v790_v37, 0.0  ;;  %v776_v17 = vadd.f32 %v3119_v48, %v712_v36  ;;  %v704_v37 = vmul.f32 %v3129_v51, %v626_v60  ;;  %v1813_v53 = vld [vmem:[%s4545_s8 + $0x30] sm:$0xff] }
 0x106   : > { %867 = vrot.lane.b32.xlu0 %v3224_v25, %s2798_s27  ;;  %v3243_v15 = vpop.permute.xlu1 %1607  ;;  %v829_v33 = vmul.f32 0.16666667, %v813_v30  ;;  %v839_v6 = vmul.f32 0.16666667, %v823_v26  ;;  %v782_v30 = vadd.f32 3.0, %v766_v5 }
 0x107   : > { %4662 = vst [vmem:[#allocation25_spill] sm:$0xff] %v3243_v15  ;;  %v3271_v54 = vmul.f32 %v837_v22, %v773_v27  ;;  %v799_v22 = vmax.f32 %v783_v47, 0.0  ;;  %v822_v46 = vmin.f32 %v806_v24, 6.0  ;;  %v792_v48 = vadd.f32 3.0, %v776_v17 }
 0x108   : > { %v3289_v58 = vmul.f32 %v829_v33, %v765_v16  ;;  %v3292_v8 = vmul.f32 %v839_v6, %v775_v21  ;;  %v798_v26 = vmax.f32 %v782_v30, 0.0  ;;  %v768_v24 = vadd.f32 %v3133_v52, %v704_v37 }
 0x109   : > { %889 = vrot.lane.b32.xlu1 %v3230_v49, %s2798_s27  ;;  %v3286_v12 = vpop.permute.xlu0 %1170  ;;  %v815_v1 = vmin.f32 %v799_v22, 6.0  ;;  %v838_v36 = vmul.f32 0.16666667, %v822_v46  ;;  %v808_v21 = vmax.f32 %v792_v48, 0.0 }
 0x10a   : > { %891 = vrot.lane.b32.xlu0 %v3233_v29, %s2798_s27  ;;  %4666 = vst [vmem:[#allocation29_spill] sm:$0xff] %v3292_v8  ;;  %v814_v51 = vmin.f32 %v798_v26, 6.0  ;;  %v784_v60 = vadd.f32 3.0, %v768_v24 }
 0x10b   : > { %v3258_v0 = vpop.permute.xlu1 %1150  ;;  %v831_v33 = vmul.f32 0.16666667, %v815_v1  ;;  %v3308_v6 = vmul.f32 %v838_v36, %v774_v40  ;;  %v824_v30 = vmin.f32 %v808_v21, 6.0 }
 0x10c   : > { %4664 = vst [vmem:[#allocation27_spill] sm:$0xff] %v3258_v0  ;;  %v830_v1 = vmul.f32 0.16666667, %v814_v51  ;;  %v800_v40 = vmax.f32 %v784_v60, 0.0 }
 0x10d   : > { %968 = vrot.lane.b32.xlu1 %v3230_v49, %s2799_s30  ;;  %v3301_v16 = vpop.permute.xlu0 %1162  ;;  %v3312_v46 = vmul.f32 %v831_v33, %v767_v14  ;;  %v840_v48 = vmul.f32 0.16666667, %v824_v30 }
 0x10e   : > { %970 = vrot.lane.b32.xlu0 %v3233_v29, %s2799_s30  ;;  %4667 = vst [vmem:[#allocation30_spill] sm:$0xff] %v3301_v16  ;;  %v3324_v14 = vmul.f32 %v830_v1, %v766_v5  ;;  %v816_v36 = vmin.f32 %v800_v40, 6.0  ;;  %v4674_v40 = vmov 3  }
 0x10f   : > { %v3330_v33 = vmul.f32 %v840_v48, %v776_v17 }
 0x110   : > { %v3266_v62 = vpop.permute.xlu1 %1483  ;;  %v832_v51 = vmul.f32 0.16666667, %v816_v36  ;;  %v4678_v36 = vmov 5  }
 0x111   : > { %881 = vrot.lane.b32.xlu1 %v3199_v32, %s2798_s27  ;;  %4665 = vst [vmem:[#allocation28_spill] sm:$0xff] %v3266_v62  ;;  %v3316_v52 = vpop.permute.xlu0 %1154  ;;  %v1814_v62 = vld [vmem:[%s4545_s8 + $0x38] sm:$0xff] }
 0x112   : > { %883 = vrot.lane.b32.xlu0 %v3250_v20, %s2798_s27  ;;  %4669 = vst [vmem:[#allocation32_spill] sm:$0xff] %v3316_v52  ;;  %v3346_v17 = vmul.f32 %v832_v51, %v768_v24 }
 0x114   : > { %v3281_v27 = vpop.permute.xlu1 %1487 }
 0x115   : > { %946 = vrot.lane.b32.xlu1 %v3224_v25, %s2799_s30  ;;  %v3328_v26 = vpop.permute.xlu0 %1146  ;;  %v1745_v25 = vld [vmem:[%s4544_s7 + $0x10] sm:$0xff] }
 0x116   : > { %1299 = vperm.xlu0 %2689, %v3069_v42   ;;  %4671 = vst [vmem:[#allocation34_spill] sm:$0xff] %v3328_v26 }
 0x119   : > { %962 = vrot.lane.b32.xlu1 %v3250_v20, %s2799_s30  ;;  %v3295_v47 = vpop.permute.xlu1 %1535  ;;  %v3342_v5 = vpop.permute.xlu0 %1547 }
 0x11a   : > { %1291 = vperm.xlu0 %2689, %v3083_v43   ;;  %v1561_v44 = vmul.f32 %v3295_v47, %v3346_v17 }
 0x11d   : > { %877 = vrot.lane.b32.xlu1 %v3271_v54, %s2798_s27  ;;  %v3353_v1 = vpop.permute.xlu0 %1539 }
 0x11e   : > { %1283 = vperm.xlu0 %2689, %v3089_v45   ;;  %v3304_v22 = vpop.permute.xlu1 %1023 }
 0x11f   : > { %4668 = vst [vmem:[#allocation31_spill] sm:$0xff] %v3304_v22 }
 0x121   : > { %956 = vrot.lane.b32.xlu1 %v3271_v54, %s2799_s30  ;;  %v3361_v24 = vpop.permute.xlu0 %1531 }
 0x122   : > { %2700 = vset.pattern.permute.xlu0 %v4566_v2  ;;  %4676 = vst [vmem:[#allocation38_spill] sm:$0xff] %v3361_v24 }
 0x123   : > { %1359 = vperm.xlu0 %2700, %v3022_v31   ;;  %v3318_v37 = vpop.permute.xlu1 %1078 }
 0x124   : > { %4670 = vst [vmem:[#allocation33_spill] sm:$0xff] %v3318_v37 }
 0x125   : > { %869 = vrot.lane.b32.xlu1 %v3289_v58, %s2798_s27  ;;  %v3370_v51 = vpop.permute.xlu0 %1523 }
 0x126   : > { %4679 = vst [vmem:[#allocation40_spill] sm:$0xff] %v3370_v51 }
 0x127   : > { %879 = vrot.lane.b32.xlu0 %v3292_v8, %s2798_s27  ;;  %v3332_v21 = vpop.permute.xlu1 %1082 }
 0x128   : > { %4672 = vst [vmem:[#allocation35_spill] sm:$0xff] %v3332_v21 }
 0x129   : > { %948 = vrot.lane.b32.xlu1 %v3289_v58, %s2799_s30  ;;  %v3375_v26 = vpop.permute.xlu0 %1611 }
 0x12b   : > { %958 = vrot.lane.b32.xlu0 %v3292_v8, %s2799_s30 }
 0x12c   : > { %v3338_v60 = vpop.permute.xlu1 %1599 }
 0x12d   : > { %893 = vrot.lane.b32.xlu1 %v3308_v6, %s2798_s27  ;;  %v3385_v21 = vpop.permute.xlu0 %1603 }
 0x12f   : > { %871 = vrot.lane.b32.xlu0 %v3312_v46, %s2798_s27 }
 0x131   : > { %972 = vrot.lane.b32.xlu1 %v3308_v6, %s2799_s30  ;;  %v3349_v30 = vpop.permute.xlu1 %1142 }
 0x132   : > { %4673 = vst [vmem:[#allocation36_spill] sm:$0xff] %v3349_v30 }
 0x133   : > { %950 = vrot.lane.b32.xlu0 %v3312_v46, %s2799_s30 }
 0x135   : > { %885 = vrot.lane.b32.xlu1 %v3324_v14, %s2798_s27 }
 0x136   : > { %v3359_v48 = vpop.permute.xlu1 %1475 }
 0x137   : > { %895 = vrot.lane.b32.xlu0 %v3330_v33, %s2798_s27  ;;  %4675 = vst [vmem:[#allocation37_spill] sm:$0xff] %v3359_v48  ;;  %v4684_v48 = vmov 0  }
 0x139   : > { %964 = vrot.lane.b32.xlu1 %v3324_v14, %s2799_s30 }
 0x13b   : > { %974 = vrot.lane.b32.xlu0 %v3330_v33, %s2799_s30 }
 0x13d   : > { %1423 = vperm.xlu1 %2692, %v3022_v31   ;;  %v3366_v31 = vpop.permute.xlu1 %1479 }
 0x13e   : > { %4677 = vst [vmem:[#allocation39_spill] sm:$0xff] %v3366_v31 }
 0x13f   : > { %887 = vrot.lane.b32.xlu0 %v3346_v17, %s2798_s27  ;;  %s2471_s27 = sshll.u32 %s4468_s21, 4  ;;  %s4491_s27 = int_to_ptr.vmem [resolvable:$true] %s2471_s27 }
 0x140   : > { %s2727_s17 = scalar_lea.vmem %s4491_s27, 1024  ;;  %p2734_p0 = scmp.lt.s32.totalorder %s4491_s27, %s2732_s18 }
 0x141   : > { %2693 = vset.pattern.permute.xlu1 %v4674_v40  ;;  %p2728_p11 = scmp.ne.s32.totalorder %s4491_s27, %s2727_s17 }
 0x142   : > { %1303 = vperm.xlu1 %2693, %v3050_v38  }
 0x143   : > { %966 = vrot.lane.b32.xlu0 %v3346_v17, %s2799_s30  ;;  %p2729_p12 = pnand %p2728_p11, %p2929_p5 }
 0x145   : > { %p2730_p13 = pneg %p2729_p12 }
 0x146   : > { %2694 = vset.pattern.permute.xlu1 %v4566_v2  ;;  %v3377_v2 = vpop.permute.xlu1 %1527 }
 0x147   : > { %1347 = vperm.xlu1 %2694, %v3069_v42   ;;  %1351 = vperm.xlu0 %2700, %v3050_v38   ;;  %4680 = vst [vmem:[#allocation41_spill] sm:$0xff] %v3377_v2  ;;  %v3392_v2 = vpop.permute.xlu0 %1595 }
 0x148   : > { %4683 = vst [vmem:[#allocation43_spill] sm:$0xff] %v3392_v2  ;;  %v522_v2 = vld [vmem:[%s4539_s2] sm:$0x3] }
 0x149   : > { %vm916_vm1 = vcmp.ge.s32.totalorder %v522_v2, 1  ;;  %vm993_vm2 = vcmp.lt.s32.totalorder %v522_v2, 15 }
 0x14a   : > { %v3382_v31 = vpop.permute.xlu1 %1587  ;;  %v917_v20 = vsel %vm916_vm1, 1, %v4684_v48  ;;  %vm2803_vm1 = vmmov 0  }
 0x14b   : > { %2695 = vset.pattern.permute.xlu1 %v4678_v36  ;;  %1343 = vperm.xlu0 %2700, %v3056_v39   ;;  %4681 = vst [vmem:[#allocation42_spill] sm:$0xff] %v3382_v31  ;;  %v3404_v30 = vpop.permute.xlu0 %1591 }
 0x14c   : > { %1411 = vperm.xlu1 %2695, %v3069_v42   ;;  %v4682_v42 = vmov 4   ;;  %4685 = vst [vmem:[#allocation44_spill] sm:$0xff] %v3404_v30 }
 0x14e   : > { %v3390_v51 = vpop.permute.xlu1 %1311 }
 0x14f   : > { %1335 = vperm.xlu0 %2700, %v3064_v41   ;;  %v3410_v37 = vpop.permute.xlu0 %1307 }
 0x150   : > { %1415 = vperm.xlu1 %2695, %v3050_v38  }
 0x152   : > { %v3398_v31 = vpop.permute.xlu1 %1355 }
 0x153   : > { %2703 = vset.pattern.permute.xlu0 %v4678_v36 }
 0x154   : > { %2696 = vset.pattern.permute.xlu1 %v4674_v40  ;;  %1403 = vperm.xlu0 %2703, %v3083_v43  }
 0x155   : > { %1295 = vperm.xlu1 %2696, %v3056_v39  }
 0x158   : > { %1395 = vperm.xlu0 %2703, %v3089_v45  }
 0x159   : > { %2697 = vset.pattern.permute.xlu1 %v4682_v42 }
 0x15a   : > { %1339 = vperm.xlu1 %2697, %v3083_v43   ;;  %v1749_v43 = vld [vmem:[%s4544_s7 + $0x30] sm:$0xff] }
 0x15c   : > { %2705 = vset.pattern.permute.xlu0 %v4684_v48 }
 0x15d   : > { %1053 = vperm.xlu0 %2705, %v3036_v35   ;;  %v3408_v35 = vpop.permute.xlu1 %1419 }
 0x15e   : > { %2698 = vset.pattern.permute.xlu1 %v4678_v36 }
 0x15f   : > { %1407 = vperm.xlu1 %2698, %v3056_v39  }
 0x161   : > { %1048 = vperm.xlu0 %2705, %v3050_v38   ;;  %v1750_v38 = vld [vmem:[%s4544_s7 + $0x38] sm:$0xff] }
 0x163   : > { %2699 = vset.pattern.permute.xlu1 %v4684_v48 }
 0x164   : > { %1783 = vperm.xlu1 %2699, %v1749_v43  }
 0x165   : > { %1038 = vperm.xlu0 %2705, %v3056_v39   ;;  %v897_v39 = vlaneseq }
 0x167   : > { %v3446_v52 = vand.u32 127, %v897_v39 }
 0x168   : > { %2701 = vset.pattern.permute.xlu1 %v4674_v40  ;;  %v1748_v40 = vld [vmem:[%s4544_s7 + $0x28] sm:$0xff] }
 0x169   : > { %1287 = vperm.xlu1 %2701, %v3064_v41   ;;  %1028 = vperm.xlu0 %2705, %v3064_v41   ;;  %vm899_vm3 = vcmp.lt.s32.totalorder %v3446_v52, 1  ;;  %vm976_vm6 = vcmp.lt.s32.totalorder %v3446_v52, 127  ;;  %vm1237_vm10 = vcmp.lt.s32.totalorder %v3446_v52, 16  ;;  %vm1682_vm14 = vcmp.lt.s32.totalorder %v3446_v52, 112 }
 0x16b   : > { %v874_v30 = vpop.permute.xlu1 %873 }
 0x16c   : > { %v3418_v22 = vpop.permute.xlu0 %960 }
 0x16d   : > { %4686 = vst [vmem:[#allocation45_spill] sm:$0xff] %v3418_v22  ;;  %2702 = vset.pattern.permute.xlu1 %v4682_v42  ;;  %1788 = vperm.xlu0 %2705, %v1750_v38   ;;  %v919_v42 = vshrl.u32 %v897_v39, 7 }
 0x16e   : > { %1331 = vperm.xlu1 %2702, %v3089_v45   ;;  %v1811_v45 = vld [vmem:[%s4545_s8 + $0x20] sm:$0xff] }
 0x16f   : > { %v953_v43 = vpop.permute.xlu1 %952  ;;  %v3451_v16 = vsub.s32 1, %v919_v42 }
 0x170   : > { %v876_v32 = vpop.permute.xlu0 %875 }
 0x171   : > { %1778 = vperm.xlu0 %2705, %v1748_v40   ;;  %v3441_v40 = vsub.s32 0, %v919_v42  ;;  %4689 = vst [vmem:[#allocation48_spill] sm:$0xff] %v3451_v16  ;;  %v925_v29 = vrot.slane %v917_v20, %v3451_v16 }
 0x172   : > { %2704 = vset.pattern.permute.xlu1 %v4684_v48 }
 0x173   : > { %v866_v38 = vpop.permute.xlu1 %865  ;;  %1847 = vperm.xlu1 %2704, %v1813_v53   ;;  %4687 = vst [vmem:[#allocation46_spill] sm:$0xff] %v3441_v40  ;;  %v921_v53 = vrot.slane %v917_v20, %v3441_v40  ;;  %vm3470_vm5 = vcmp.eq.s32.totalorder %v925_v29, 1 }
 0x174   : > { %v3435_v24 = vpop.permute.xlu0 %954 }
 0x175   : > { %1837 = vperm.xlu0 %2705, %v1811_v45   ;;  %v994_v45 = vsel %vm993_vm2, 1, %v4684_v48  ;;  %vm3456_vm4 = vcmp.eq.s32.totalorder %v921_v53, 1  ;;  %vm1926_vm2 = vcmask 523264  }
 0x176   : > { %v1002_v53 = vrot.slane %v994_v45, %v3451_v16 }
 0x177   : > { %v3448_v15 = vpop.permute.xlu1 %944  ;;  %1852 = vperm.xlu1 %2704, %v1814_v62  }
 0x178   : > { %4688 = vst [vmem:[#allocation47_spill] sm:$0xff] %v3448_v15  ;;  %v868_v0 = vpop.permute.xlu0 %867  ;;  %vm3501_vm8 = vcmp.eq.s32.totalorder %v1002_v53, 1 }
 0x179   : > { %1763 = vperm.xlu0 %2705, %v1745_v25   ;;  %v998_v25 = vrot.slane %v994_v45, %v3441_v40 }
 0x17b   : > { %v890_v2 = vpop.permute.xlu1 %889  ;;  %2706 = vset.pattern.permute.xlu1 %v4678_v36  ;;  %vm3492_vm7 = vcmp.eq.s32.totalorder %v998_v25, 1 }
 0x17c   : > { %v912_v62 = vsel %vm899_vm3, %v890_v2, %v874_v30  ;;  %1399 = vperm.xlu1 %2706, %v3064_v41   ;;  %v892_v39 = vpop.permute.xlu0 %891  ;;  %v1747_v41 = vld [vmem:[%s4544_s7 + $0x20] sm:$0xff]  ;;  %v904_v40 = vsel %vm899_vm3, %v874_v30, %v890_v2 }
 0x17d   : > { %v905_v42 = vsel %vm899_vm3, %v876_v32, %v892_v39  ;;  %v913_v20 = vsel %vm899_vm3, %v892_v39, %v876_v32  ;;  %v3476_v36 = vsel %vm3456_vm4, %v912_v62, 0.0  ;;  %v4763_v62 = vld [vmem:[#allocation48_spill] sm:$0xff] }
 0x17e   : > { %4694 = vst [vmem:[#allocation49_spill] sm:$0xff] %v3476_v36  ;;  %v3485_v32 = vsel %vm3456_vm4, %v913_v20, 0.0  ;;  %v3489_v29 = vsel %vm3470_vm5, %v905_v42, 0.0  ;;  %v1069_v30 = vmul.f32 %v3168_v3, %v3476_v36  ;;  %v3511_v20 = vsel %vm3470_vm5, %v904_v40, 0.0 }
 0x17f   : > { %4695 = vst [vmem:[#allocation50_spill] sm:$0xff] %v3485_v32  ;;  %4696 = vst [vmem:[#allocation51_spill] sm:$0xff] %v3489_v29  ;;  %v969_v45 = vpop.permute.xlu1 %968  ;;  %v1514_v32 = vmul.f32 %v3185_v18, %v3476_v36 }
 0x180   : > { %2707 = vset.pattern.permute.xlu1 %v4684_v48  ;;  %v3497_v39 = vpop.permute.xlu0 %970  ;;  %v981_v42 = vsel %vm976_vm6, %v953_v43, %v969_v45  ;;  %v989_v25 = vsel %vm976_vm6, %v969_v45, %v953_v43  ;;  %4701 = vst [vmem:[#allocation52_spill] sm:$0xff] %v3511_v20  ;;  %v1812_v48 = vld [vmem:[%s4545_s8 + $0x28] sm:$0xff]  ;;  %v1117_v43 = vmul.f32 %v3171_v4, %v3195_v28 }
 0x181   : > { %1773 = vperm.xlu1 %2707, %v1747_v41   ;;  %v3515_v16 = vsel %vm3492_vm7, %v981_v42, 0.0  ;;  %v3519_v53 = vsel %vm3501_vm8, %v989_v25, 0.0  ;;  %v1562_v45 = vmul.f32 %v3353_v1, %v3195_v28  ;;  %v1118_v42 = vmul.f32 %v3171_v4, %v3230_v49 }
 0x182   : > { %4702 = vst [vmem:[#allocation53_spill] sm:$0xff] %v3515_v16  ;;  %4703 = vst [vmem:[#allocation54_spill] sm:$0xff] %v3519_v53  ;;  %v1181_v41 = vmul.f32 %v3183_v11, %v3515_v16  ;;  %v1070_v25 = vmul.f32 %v3168_v3, %v3511_v20  ;;  %v1133_v29 = vadd.f32 %v1117_v43, %v1069_v30  ;;  %v1746_v30 = vld [vmem:[%s4544_s7 + $0x18] sm:$0xff] }
 0x183   : > { %v882_v40 = vpop.permute.xlu1 %881  ;;  %v1182_v7 = vmul.f32 %v3183_v11, %v3519_v53  ;;  %v1626_v11 = vmul.f32 %v3385_v21, %v3515_v16  ;;  %v1578_v36 = vadd.f32 %v1562_v45, %v1514_v32 }
 0x184   : > { %v884_v22 = vpop.permute.xlu0 %883  ;;  %v900_v13 = vsel %vm899_vm3, %v866_v38, %v882_v40  ;;  %v908_v28 = vsel %vm899_vm3, %v882_v40, %v866_v38  ;;  %v1197_v43 = vadd.f32 %v1181_v41, %v1133_v29  ;;  %v1563_v29 = vmul.f32 %v3353_v1, %v3230_v49 }
 0x185   : > { %1842 = vperm.xlu1 %2707, %v1812_v48   ;;  %v901_v4 = vsel %vm899_vm3, %v868_v0, %v884_v22  ;;  %v909_v3 = vsel %vm899_vm3, %v884_v22, %v868_v0  ;;  %v3553_v48 = vsel %vm3456_vm4, %v908_v28, 0.0  ;;  %v3557_v38 = vsel %vm3470_vm5, %v900_v13, 0.0 }
 0x186   : > { %4704 = vst [vmem:[#allocation55_spill] sm:$0xff] %v3557_v38  ;;  %v1515_v0 = vmul.f32 %v3185_v18, %v3511_v20  ;;  %v1134_v22 = vadd.f32 %v1118_v42, %v1070_v25  ;;  %1213 = vrot.lane.b32.xlu0 %v1197_v43, %s4637_s26  ;;  %v3566_v28 = vsel %vm3456_vm4, %v909_v3, 0.0  ;;  %v3570_v13 = vsel %vm3470_vm5, %v901_v4, 0.0 }
 0x187   : > { %v3559_v40 = vpop.permute.xlu1 %946  ;;  %v1627_v18 = vmul.f32 %v3385_v21, %v3519_v53  ;;  %v1642_v45 = vadd.f32 %v1626_v11, %v1578_v36  ;;  %v1375_v53 = vmul.f32 %v3398_v31, %v3308_v6 }
 0x188   : > { %4705 = vst [vmem:[#allocation56_spill] sm:$0xff] %v3559_v40  ;;  %v1198_v41 = vadd.f32 %v1182_v7, %v1134_v22  ;;  %v1579_v42 = vadd.f32 %v1563_v29, %v1515_v0 }
 0x189   : > { %1768 = vperm.xlu1 %2707, %v1746_v30  }
 0x18a   : > { %1229 = vrot.lane.b32.xlu0 %v1198_v41, %s4637_s26  ;;  %v1643_v25 = vadd.f32 %v1627_v18, %v1579_v42  ;;  %v1566_v41 = vmul.f32 %v3342_v5, %v3271_v54 }
 0x18b   : > { %v3576_v32 = vpop.permute.xlu1 %962 }
 0x18c   : > { %4706 = vst [vmem:[#allocation57_spill] sm:$0xff] %v3576_v32 }
 0x18d   : > { %1658 = vrot.lane.b32.xlu1 %v1642_v45, %s2801_s28  ;;  %v1567_v45 = vmul.f32 %v3342_v5, %v3308_v6 }
 0x18e   : > { %1674 = vrot.lane.b32.xlu0 %v1643_v25, %s2801_s28 }
 0x18f   : > { %v878_v3 = vpop.permute.xlu1 %877 }
 0x191   : > { %v3581_v4 = vpop.permute.xlu0 %1299 }
 0x192   : > { %4707 = vst [vmem:[#allocation58_spill] sm:$0xff] %v3581_v4 }
 0x193   : > { %v957_v1 = vpop.permute.xlu1 %956 }
 0x195   : > { %v3583_v30 = vpop.permute.xlu0 %1291 }
 0x197   : > { %v870_v21 = vpop.permute.xlu1 %869 }
 0x199   : > { %v3585_v7 = vpop.permute.xlu0 %1283 }
 0x19b   : > { %v3587_v43 = vpop.permute.xlu1 %948 }
 0x19e   : > { %v1360_v36 = vpop.permute.xlu0 %1359 }
 0x19f   : > { %v894_v11 = vpop.permute.xlu1 %893 }
 0x1a0   : > { %v906_v0 = vsel %vm899_vm3, %v878_v3, %v894_v11  ;;  %v914_v22 = vsel %vm899_vm3, %v894_v11, %v878_v3 }
 0x1a1   : > { %v3595_v29 = vsel %vm3456_vm4, %v914_v22, 0.0  ;;  %v3599_v18 = vsel %vm3470_vm5, %v906_v0, 0.0  ;;  %v1374_v22 = vmul.f32 %v3398_v31, %v3271_v54 }
 0x1a2   : > { %v880_v42 = vpop.permute.xlu0 %879  ;;  %v1326_v25 = vmul.f32 %v3410_v37, %v3595_v29  ;;  %v1327_v3 = vmul.f32 %v3410_v37, %v3599_v18  ;;  %v1518_v11 = vmul.f32 %v3156_v59, %v3595_v29  ;;  %v1519_v0 = vmul.f32 %v3156_v59, %v3599_v18 }
 0x1a3   : > { %v973_v5 = vpop.permute.xlu1 %972 }
 0x1a4   : > { %v983_v16 = vsel %vm976_vm6, %v957_v1, %v973_v5  ;;  %v991_v20 = vsel %vm976_vm6, %v973_v5, %v957_v1  ;;  %v3621_v37 = vadd.f32 %v1566_v41, %v1518_v11  ;;  %v3623_v4 = vadd.f32 %v1567_v45, %v1519_v0 }
 0x1a5   : > { %v3627_v59 = vsel %vm3492_vm7, %v983_v16, 0.0  ;;  %v3631_v49 = vsel %vm3501_vm8, %v991_v20, 0.0  ;;  %v1390_v31 = vadd.f32 %v1374_v22, %v1326_v25  ;;  %v1391_v40 = vadd.f32 %v1375_v53, %v1327_v3 }
 0x1a6   : > { %4708 = vst [vmem:[#allocation59_spill] sm:$0xff] %v3621_v37  ;;  %4709 = vst [vmem:[#allocation60_spill] sm:$0xff] %v3627_v59  ;;  %v1438_v32 = vmul.f32 %v3408_v35, %v3627_v59  ;;  %v1439_v1 = vmul.f32 %v3408_v35, %v3631_v49  ;;  %v959_v41 = vpop.permute.xlu0 %958  ;;  %v1377_v37 = vmul.f32 %v1360_v36, %v3330_v33 }
 0x1a7   : > { %v886_v11 = vpop.permute.xlu1 %885 }
 0x1a8   : > { %v902_v45 = vsel %vm899_vm3, %v870_v21, %v886_v11  ;;  %v910_v16 = vsel %vm899_vm3, %v886_v11, %v870_v21  ;;  %v3641_v0 = vadd.f32 %v1438_v32, %v1390_v31  ;;  %v3643_v20 = vadd.f32 %v1439_v1, %v1391_v40 }
 0x1a9   : > { %v3647_v53 = vsel %vm3456_vm4, %v910_v16, 0.0  ;;  %v3651_v25 = vsel %vm3470_vm5, %v902_v45, 0.0 }
 0x1aa   : > { %4710 = vst [vmem:[#allocation61_spill] sm:$0xff] %v3641_v0  ;;  %4711 = vst [vmem:[#allocation62_spill] sm:$0xff] %v3643_v20  ;;  %v872_v35 = vpop.permute.xlu0 %871  ;;  %v1376_v0 = vmul.f32 %v1360_v36, %v3292_v8 }
 0x1ab   : > { %v965_v21 = vpop.permute.xlu1 %964 }
 0x1ae   : > { %v951_v3 = vpop.permute.xlu0 %950 }
 0x1b2   : > { %v896_v22 = vpop.permute.xlu0 %895 }
 0x1b3   : > { %v907_v5 = vsel %vm899_vm3, %v880_v42, %v896_v22  ;;  %v915_v32 = vsel %vm899_vm3, %v896_v22, %v880_v42  ;;  %v1124_v42 = vmul.f32 %v3146_v56, %v3330_v33  ;;  %v1569_v22 = vmul.f32 %v3164_v63, %v3330_v33 }
 0x1b4   : > { %v3659_v40 = vsel %vm3456_vm4, %v915_v32, 0.0  ;;  %v943_v31 = vsel %vm3470_vm5, %v907_v5, 0.0 }
 0x1b5   : > { %4712 = vst [vmem:[#allocation63_spill] sm:$0xff] %v3659_v40  ;;  %v1076_v1 = vmul.f32 %v3142_v55, %v943_v31  ;;  %v1328_v11 = vmul.f32 %v3390_v51, %v3659_v40  ;;  %v1329_v45 = vmul.f32 %v3390_v51, %v943_v31  ;;  %v1521_v16 = vmul.f32 %v3160_v61, %v943_v31 }
 0x1b6   : > { %v975_v20 = vpop.permute.xlu0 %974 }
 0x1b7   : > { %v984_v32 = vsel %vm976_vm6, %v959_v41, %v975_v20  ;;  %v992_v5 = vsel %vm976_vm6, %v975_v20, %v959_v41  ;;  %v1140_v56 = vadd.f32 %v1124_v42, %v1076_v1  ;;  %v1585_v63 = vadd.f32 %v1569_v22, %v1521_v16 }
 0x1b8   : > { %v3680_v51 = vsel %vm3492_vm7, %v984_v32, 0.0  ;;  %v1020_v31 = vsel %vm3501_vm8, %v992_v5, 0.0  ;;  %v1424_v61 = vpop.permute.xlu1 %1423  ;;  %v1392_v59 = vadd.f32 %v1376_v0, %v1328_v11  ;;  %v1393_v41 = vadd.f32 %v1377_v37, %v1329_v45 }
 0x1b9   : > { %v1188_v55 = vmul.f32 %v3286_v12, %v1020_v31  ;;  %v1633_v40 = vmul.f32 %v3181_v9, %v1020_v31  ;;  %v1440_v20 = vmul.f32 %v1424_v61, %v3680_v51  ;;  %v1441_v8 = vmul.f32 %v1424_v61, %v1020_v31 }
 0x1ba   : > { %v888_v33 = vpop.permute.xlu0 %887 }
 0x1bb   : > { %v3687_v36 = vadd.f32 %v1188_v55, %v1140_v56  ;;  %v3689_v32 = vadd.f32 %v1633_v40, %v1585_v63  ;;  %v3691_v38 = vadd.f32 %v1440_v20, %v1392_v59  ;;  %v3693_v5 = vadd.f32 %v1441_v8, %v1393_v41 }
 0x1bc   : > { %v903_v1 = vsel %vm899_vm3, %v872_v35, %v888_v33  ;;  %v911_v16 = vsel %vm899_vm3, %v888_v33, %v872_v35  ;;  %v1560_v59 = vmul.f32 %v3295_v47, %v3312_v46  ;;  %vm2050_vm3 = vcmask 130048  }
 0x1bd   : > { %4713 = vst [vmem:[#allocation64_spill] sm:$0xff] %v3687_v36  ;;  %4714 = vst [vmem:[#allocation65_spill] sm:$0xff] %v3689_v32  ;;  %v3701_v37 = vsel %vm3456_vm4, %v911_v16, 0.0  ;;  %v3705_v55 = vsel %vm3470_vm5, %v903_v1, 0.0  ;;  %v3707_v56 = vpop.permute.xlu1 %1303  ;;  %v979_v16 = vsel %vm976_vm6, %v3587_v43, %v965_v21 }
 0x1be   : > { %4715 = vst [vmem:[#allocation66_spill] sm:$0xff] %v3691_v38  ;;  %4716 = vst [vmem:[#allocation67_spill] sm:$0xff] %v3693_v5  ;;  %v1512_v61 = vmul.f32 %v3281_v27, %v3701_v37  ;;  %v1513_v63 = vmul.f32 %v3281_v27, %v3705_v55  ;;  %v967_v8 = vpop.permute.xlu0 %966  ;;  %v1319_v5 = vmul.f32 %v3583_v30, %v3651_v25 }
 0x1bf   : > { %4717 = vst [vmem:[#allocation68_spill] sm:$0xff] %v3707_v56  ;;  %v980_v15 = vsel %vm976_vm6, %v951_v3, %v967_v8  ;;  %v988_v0 = vsel %vm976_vm6, %v967_v8, %v951_v3 }
 0x1c0   : > { %v3723_v35 = vsel %vm3492_vm7, %v980_v15, 0.0  ;;  %v3727_v27 = vsel %vm3501_vm8, %v988_v0, 0.0  ;;  %v1576_v40 = vadd.f32 %v1560_v59, %v1512_v61  ;;  %v1577_v11 = vadd.f32 %v1561_v44, %v1513_v63 }
 0x1c1   : > { %v1624_v45 = vmul.f32 %v3338_v60, %v3723_v35  ;;  %v1625_v47 = vmul.f32 %v3338_v60, %v3727_v27  ;;  %v987_v60 = vsel %vm976_vm6, %v965_v21, %v3587_v43  ;;  %v3755_v61 = vsel %vm3492_vm7, %v979_v16, 0.0 }
 0x1c2   : > { %v3733_v42 = vpop.permute.xlu1 %1347  ;;  %v3735_v22 = vpop.permute.xlu0 %1351  ;;  %v3759_v63 = vsel %vm3501_vm8, %v987_v60, 0.0  ;;  %v1318_v60 = vmul.f32 %v3583_v30, %v3647_v53  ;;  %v982_v30 = vsel %vm976_vm6, %v3435_v24, %v3497_v39 }
 0x1c3   : > { %4718 = vst [vmem:[#allocation69_spill] sm:$0xff] %v3733_v42  ;;  %4719 = vst [vmem:[#allocation70_spill] sm:$0xff] %v3735_v22  ;;  %v3737_v3 = vadd.f32 %v1624_v45, %v1576_v40  ;;  %v3739_v31 = vadd.f32 %v1625_v47, %v1577_v11  ;;  %v4733_v22 = vld [vmem:[#allocation45_spill] sm:$0xff] }
 0x1c5   : > { %4720 = vst [vmem:[#allocation71_spill] sm:$0xff] %v3737_v3  ;;  %4721 = vst [vmem:[#allocation72_spill] sm:$0xff] %v3739_v31 }
 0x1c6   : > { %v1344_v41 = vpop.permute.xlu0 %1343 }
 0x1c7   : > { %v3741_v20 = vpop.permute.xlu1 %1411  ;;  %v1368_v0 = vmul.f32 %v1344_v41, %v3312_v46  ;;  %v1369_v40 = vmul.f32 %v1344_v41, %v3346_v17  ;;  %v3777_v41 = vmul.f32 %v3197_v34, %v3206_v10 }
 0x1c8   : > { %4722 = vst [vmem:[#allocation73_spill] sm:$0xff] %v3741_v20  ;;  %v4741_v20 = vld [vmem:[#allocation32_spill] sm:$0xff] }
 0x1c9   : > { %v1179_v42 = vmul.f32 %v4741_v20, %v3723_v35 }
 0x1ca   : > { %v3743_v33 = vpop.permute.xlu0 %1335 }
 0x1cb   : > { %v3745_v1 = vpop.permute.xlu1 %1415 }
 0x1cc   : > { %4723 = vst [vmem:[#allocation74_spill] sm:$0xff] %v3745_v1 }
 0x1cf   : > { %v1404_v8 = vpop.permute.xlu0 %1403 }
 0x1d0   : > { %v1296_v59 = vpop.permute.xlu1 %1295  ;;  %v1430_v44 = vmul.f32 %v1404_v8, %v3755_v61  ;;  %v1431_v15 = vmul.f32 %v1404_v8, %v3759_v63 }
 0x1d1   : > { %v1320_v43 = vmul.f32 %v1296_v59, %v3701_v37  ;;  %v1321_v21 = vmul.f32 %v1296_v59, %v3705_v55 }
 0x1d3   : > { %v1384_v11 = vadd.f32 %v1368_v0, %v1320_v43  ;;  %v1385_v45 = vadd.f32 %v1369_v40, %v1321_v21  ;;  %v3767_v47 = vpop.permute.xlu0 %1395  ;;  %v1121_v40 = vmul.f32 %v3274_v19, %v3271_v54  ;;  %v1122_v43 = vmul.f32 %v3274_v19, %v3308_v6 }
 0x1d4   : > { %v1113_v54 = vmul.f32 %v3222_v23, %v3289_v58  ;;  %v1186_v19 = vmul.f32 %v3150_v57, %v3631_v49 }
 0x1d5   : > { %v1340_v16 = vpop.permute.xlu1 %1339 }
 0x1d6   : > { %v1366_v8 = vmul.f32 %v1340_v16, %v3289_v58  ;;  %v1367_v38 = vmul.f32 %v1340_v16, %v3324_v14  ;;  %v990_v16 = vsel %vm976_vm6, %v3497_v39, %v3435_v24 }
 0x1d8   : > { %v1382_v59 = vadd.f32 %v1366_v8, %v1318_v60  ;;  %v1383_v0 = vadd.f32 %v1367_v38, %v1319_v5  ;;  %v1054_v21 = vpop.permute.xlu0 %1053 }
 0x1d9   : > { %v1073_v60 = vmul.f32 %v1054_v21, %v3595_v29  ;;  %v1074_v38 = vmul.f32 %v1054_v21, %v3599_v18  ;;  %v1114_v29 = vmul.f32 %v3222_v23, %v3324_v14  ;;  %v1115_v18 = vmul.f32 %v3235_v50, %v3312_v46  ;;  %v4729_v23 = vld [vmem:[#allocation20_spill] sm:$0xff] }
 0x1da   : > { %v1408_v6 = vpop.permute.xlu1 %1407  ;;  %v3797_v5 = vadd.f32 %v1430_v44, %v1382_v59  ;;  %v3799_v8 = vadd.f32 %v1431_v15, %v1383_v0  ;;  %v3811_v21 = vsel %vm3492_vm7, %v982_v30, 0.0  ;;  %v3815_v44 = vsel %vm3501_vm8, %v990_v16, 0.0 }
 0x1db   : > { %v3801_v1 = vadd.f32 %v1121_v40, %v1073_v60  ;;  %v1138_v56 = vadd.f32 %v1122_v43, %v1074_v38  ;;  %v1432_v24 = vmul.f32 %v1408_v6, %v3723_v35  ;;  %v1433_v39 = vmul.f32 %v1408_v6, %v3727_v27  ;;  %4726 = vst [vmem:[#allocation77_spill] sm:$0xff] %v3811_v21  ;;  %v4730_v60 = vld [vmem:[#allocation14_spill] sm:$0xff] }
 0x1dc   : > { %4724 = vst [vmem:[#allocation75_spill] sm:$0xff] %v3797_v5  ;;  %4725 = vst [vmem:[#allocation76_spill] sm:$0xff] %v3799_v8  ;;  %v1049_v15 = vpop.permute.xlu0 %1048  ;;  %v1631_v59 = vmul.f32 %v3375_v26, %v3631_v49  ;;  %v1065_v46 = vmul.f32 %v4729_v23, %v3647_v53  ;;  %v1119_v30 = vmul.f32 %v4730_v60, %v3206_v10  ;;  %v4731_v38 = vld [vmem:[#allocation50_spill] sm:$0xff]  ;;  %v4732_v8 = vld [vmem:[#allocation51_spill] sm:$0xff] }
 0x1dd   : > { %v1202_v0 = vadd.f32 %v1186_v19, %v1138_v56  ;;  %v3819_v40 = vadd.f32 %v1432_v24, %v1384_v11  ;;  %v3821_v43 = vadd.f32 %v1433_v39, %v1385_v45  ;;  %v1071_v6 = vmul.f32 %v1049_v15, %v4731_v38  ;;  %v4734_v49 = vld [vmem:[#allocation47_spill] sm:$0xff]  ;;  %v4735_v11 = vld [vmem:[#allocation16_spill] sm:$0xff] }
 0x1de   : > { %v1072_v16 = vmul.f32 %v1049_v15, %v4732_v8  ;;  %v1116_v5 = vmul.f32 %v3235_v50, %v3346_v17  ;;  %v977_v56 = vsel %vm976_vm6, %v4734_v49, %v4733_v22  ;;  %v1516_v45 = vmul.f32 %v4735_v11, %v4731_v38  ;;  %v4736_v19 = vld [vmem:[#allocation24_spill] sm:$0xff]  ;;  %v4738_v15 = vld [vmem:[#allocation30_spill] sm:$0xff]  ;;  %v4739_v17 = vld [vmem:[#allocation27_spill] sm:$0xff] }
 0x1df   : > { %4727 = vst [vmem:[#allocation78_spill] sm:$0xff] %v3819_v40  ;;  %4728 = vst [vmem:[#allocation79_spill] sm:$0xff] %v3821_v43  ;;  %v1120_v24 = vmul.f32 %v4730_v60, %v4736_v19  ;;  %v3839_v39 = vpop.permute.xlu1 %1783  ;;  %1233 = vrot.lane.b32.xlu0 %v1202_v0, %s4637_s26  ;;  %v1183_v43 = vmul.f32 %v4738_v15, %v3811_v21  ;;  %v1184_v50 = vmul.f32 %v4738_v15, %v3815_v44  ;;  %v4740_v38 = vld [vmem:[#allocation25_spill] sm:$0xff] }
 0x1e0   : > { %4737 = vst [vmem:[#allocation20_spill] sm:$0xff] %v3839_v39  ;;  %v1177_v40 = vmul.f32 %v4739_v17, %v3755_v61  ;;  %v1135_v10 = vadd.f32 %v1119_v30, %v1071_v6  ;;  %v1039_v31 = vpop.permute.xlu0 %1038  ;;  %v1628_v3 = vmul.f32 %v4740_v38, %v3811_v21  ;;  %v1647_v0 = vadd.f32 %v1631_v59, %v3623_v4  ;;  %v4743_v4 = vld [vmem:[#allocation26_spill] sm:$0xff] }
 0x1e1   : > { %v1067_v60 = vmul.f32 %v1039_v31, %v3701_v37  ;;  %v1068_v39 = vmul.f32 %v1039_v31, %v3705_v55  ;;  %v1066_v32 = vmul.f32 %v4729_v23, %v3651_v25  ;;  %v1129_v36 = vadd.f32 %v1113_v54, %v1065_v46  ;;  %v4742_v37 = vld [vmem:[#allocation22_spill] sm:$0xff] }
 0x1e2   : > { %v1136_v9 = vadd.f32 %v1120_v24, %v1072_v16  ;;  %v1199_v15 = vadd.f32 %v1183_v43, %v1135_v10  ;;  %v1180_v30 = vmul.f32 %v4741_v20, %v3727_v27  ;;  %v1364_v55 = vmul.f32 %v3743_v33, %v4742_v37  ;;  %v4744_v16 = vld [vmem:[#allocation28_spill] sm:$0xff] }
 0x1e3   : > { %v1131_v6 = vadd.f32 %v1115_v18, %v1067_v60  ;;  %v1132_v21 = vadd.f32 %v1116_v5, %v1068_v39  ;;  %1678 = vrot.lane.b32.xlu0 %v1647_v0, %s2801_s28  ;;  %v1365_v31 = vmul.f32 %v3743_v33, %v4743_v4  ;;  %v1178_v54 = vmul.f32 %v4739_v17, %v3759_v63  ;;  %v4749_v60 = vld [vmem:[#allocation18_spill] sm:$0xff] }
 0x1e4   : > { %v1288_v10 = vpop.permute.xlu1 %1287  ;;  %1215 = vrot.lane.b32.xlu1 %v1199_v15, %s4637_s26  ;;  %v3867_v35 = vpop.permute.xlu0 %1028  ;;  %v1193_v59 = vadd.f32 %v1177_v40, %v1129_v36  ;;  %v1517_v33 = vmul.f32 %v4735_v11, %v4732_v8  ;;  %v1580_v43 = vadd.f32 %v3777_v41, %v1516_v45  ;;  %v1200_v23 = vadd.f32 %v1184_v50, %v1136_v9  ;;  %v4748_v50 = vld [vmem:[#allocation21_spill] sm:$0xff] }
 0x1e5   : > { %v3869_v27 = vadd.f32 %v1179_v42, %v1131_v6  ;;  %v3871_v20 = vadd.f32 %v1180_v30, %v1132_v21  ;;  %v1316_v5 = vmul.f32 %v1288_v10, %v3566_v28  ;;  %v1317_v18 = vmul.f32 %v1288_v10, %v3570_v13  ;;  %v4745_v42 = vld [vmem:[#allocation38_spill] sm:$0xff] }
 0x1e6   : > { %v1130_v46 = vadd.f32 %v1114_v29, %v1066_v32  ;;  %v1510_v24 = vmul.f32 %v4744_v16, %v3647_v53  ;;  %v1558_v21 = vmul.f32 %v4745_v42, %v3289_v58  ;;  %v1565_v40 = vmul.f32 %v3197_v34, %v4736_v19  ;;  %v4746_v58 = vld [vmem:[#allocation43_spill] sm:$0xff] }
 0x1e7   : > { %v3880_v39 = vadd.f32 %v1364_v55, %v1316_v5  ;;  %v3882_v36 = vadd.f32 %v1365_v31, %v1317_v18  ;;  %1209 = vrot.lane.b32.xlu0 %v1193_v59, %s4637_s26  ;;  %v985_v9 = vsel %vm976_vm6, %v4733_v22, %v4734_v49  ;;  %v3895_v53 = vsel %vm3492_vm7, %v977_v56, 0.0  ;;  %v4747_v49 = vld [vmem:[#allocation55_spill] sm:$0xff] }
 0x1e8   : > { %1231 = vrot.lane.b32.xlu1 %v1200_v23, %s4637_s26  ;;  %v3898_v32 = vpop.permute.xlu0 %1788  ;;  %v1629_v41 = vmul.f32 %v4740_v38, %v3815_v44  ;;  %v1622_v29 = vmul.f32 %v4746_v58, %v3755_v61  ;;  %v1194_v11 = vadd.f32 %v1178_v54, %v1130_v46  ;;  %v1644_v45 = vadd.f32 %v1628_v3, %v1580_v43  ;;  %v4750_v43 = vld [vmem:[#allocation60_spill] sm:$0xff]  ;;  %v4751_v46 = vld [vmem:[#allocation31_spill] sm:$0xff] }
 0x1e9   : > { %v1332_v34 = vpop.permute.xlu1 %1331  ;;  %v1314_v22 = vmul.f32 %v3585_v7, %v3553_v48  ;;  %v1315_v56 = vmul.f32 %v3585_v7, %v4747_v49  ;;  %v1581_v15 = vadd.f32 %v1565_v40, %v1517_v33  ;;  %v1511_v38 = vmul.f32 %v4744_v16, %v3651_v25 }
 0x1ea   : > { %v1362_v17 = vmul.f32 %v1332_v34, %v4748_v50  ;;  %v1363_v0 = vmul.f32 %v1332_v34, %v4749_v60  ;;  %v1574_v30 = vadd.f32 %v1558_v21, %v1510_v24  ;;  %v3914_v61 = vsel %vm3501_vm8, %v985_v9, 0.0 }
 0x1eb   : > { %1225 = vrot.lane.b32.xlu0 %v1194_v11, %s4637_s26  ;;  %v1426_v3 = vmul.f32 %v3767_v47, %v3895_v53  ;;  %v1427_v7 = vmul.f32 %v3767_v47, %v3914_v61  ;;  %v1559_v25 = vmul.f32 %v4745_v42, %v3324_v14  ;;  %v1623_v54 = vmul.f32 %v4746_v58, %v3759_v63  ;;  %v3943_v63 = vld [vmem:[%s4538_s1] sm:$0x3]  ;;  %v4755_v11 = vld [vmem:[#allocation57_spill] sm:$0xff] }
 0x1ec   : > { %v1378_v6 = vadd.f32 %v1362_v17, %v1314_v22  ;;  %v1379_v55 = vadd.f32 %v1363_v0, %v1315_v56  ;;  %1660 = vrot.lane.b32.xlu1 %v1644_v45, %s2801_s28  ;;  %v3922_v31 = vpop.permute.xlu0 %1778  ;;  %v1638_v10 = vadd.f32 %v1622_v29, %v1574_v30  ;;  %v1645_v5 = vadd.f32 %v1629_v41, %v1581_v15  ;;  %v4753_v41 = vld [vmem:[#allocation63_spill] sm:$0xff]  ;;  %v4754_v58 = vld [vmem:[#allocation10_spill] sm:$0xff]  ;;  %v4756_v45 = vld [vmem:[#allocation56_spill] sm:$0xff] }
 0x1ed   : > { %v1575_v47 = vadd.f32 %v1559_v25, %v1511_v38  ;;  %v1185_v23 = vmul.f32 %v3150_v57, %v4750_v43  ;;  %v1061_v16 = vmul.f32 %v4751_v46, %v3553_v48  ;;  %v1630_v42 = vmul.f32 %v3375_v26, %v4750_v43  ;;  %v4752_v57 = vld [vmem:[#allocation33_spill] sm:$0xff]  ;;  %v1809_v22 = vld [vmem:[%s4545_s8 + $0x10] sm:$0xff]  ;;  %v4758_v0 = vld [vmem:[#allocation11_spill] sm:$0xff] }
 0x1ee   : > { %v3928_v59 = vpop.permute.xlu1 %1847  ;;  %v3930_v18 = vadd.f32 %v1426_v3, %v1378_v6  ;;  %v3932_v33 = vadd.f32 %v1427_v7, %v1379_v55  ;;  %v1109_v9 = vmul.f32 %v4752_v57, %v4748_v50  ;;  %v1075_v29 = vmul.f32 %v4754_v58, %v4753_v41  ;;  %v4757_v17 = vld [vmem:[#allocation29_spill] sm:$0xff]  ;;  %v4759_v7 = vld [vmem:[#allocation59_spill] sm:$0xff] }
 0x1ef   : > { %1654 = vrot.lane.b32.xlu0 %v1638_v10, %s2801_s28  ;;  %v1639_v24 = vadd.f32 %v1623_v54, %v1575_v47  ;;  %v1201_v21 = vadd.f32 %v1185_v23, %v3801_v1  ;;  %vm1254_vm9 = vcmp.ge.s32.totalorder %v3943_v63, 1  ;;  %v1062_v34 = vmul.f32 %v4751_v46, %v4747_v49  ;;  %v4761_v10 = vld [vmem:[#allocation36_spill] sm:$0xff]  ;;  %v4764_v58 = vld [vmem:[#allocation17_spill] sm:$0xff] }
 0x1f0   : > { %1676 = vrot.lane.b32.xlu1 %v1645_v5, %s2801_s28  ;;  %v3938_v14 = vpop.permute.xlu0 %1837  ;;  %v978_v26 = vsel %vm976_vm6, %v4756_v45, %v4755_v11  ;;  %v986_v1 = vsel %vm976_vm6, %v4755_v11, %v4756_v45  ;;  %v1125_v56 = vadd.f32 %v1109_v9, %v1061_v16  ;;  %v1123_v15 = vmul.f32 %v4758_v0, %v4757_v17  ;;  %v4766_v11 = vld [vmem:[#allocation23_spill] sm:$0xff] }
 0x1f1   : > { %v1187_v38 = vmul.f32 %v3286_v12, %v3680_v51  ;;  %v1110_v3 = vmul.f32 %v4752_v57, %v4749_v60  ;;  %v1646_v6 = vadd.f32 %v1630_v42, %v4759_v7  ;;  %v4760_v55 = vmov 0   ;;  %v4771_v7 = vld [vmem:[#allocation53_spill] sm:$0xff] }
 0x1f2   : > { %v3950_v40 = vpop.permute.xlu1 %1852  ;;  %v1255_v25 = vsel %vm1254_vm9, 1, %v4760_v55  ;;  %v1139_v54 = vadd.f32 %v1123_v15, %v1075_v29  ;;  %v1173_v5 = vmul.f32 %v4761_v10, %v3895_v53  ;;  %v3986_v47 = vsel %vm3492_vm7, %v978_v26, 0.0  ;;  %v4765_v29 = vld [vmem:[#allocation69_spill] sm:$0xff] }
 0x1f3   : > { %1670 = vrot.lane.b32.xlu0 %v1639_v24, %s2801_s28  ;;  %v3990_v12 = vsel %vm3501_vm8, %v986_v1, 0.0  ;;  %v1126_v23 = vadd.f32 %v1110_v3, %v1062_v34  ;;  %v1263_v9 = vrot.slane %v1255_v25, %v4763_v62  ;;  %v1370_v2 = vmul.f32 %v4765_v29, %v4764_v58  ;;  %v4767_v1 = vld [vmem:[#allocation12_spill] sm:$0xff]  ;;  %v4768_v15 = vld [vmem:[#allocation49_spill] sm:$0xff] }
 0x1f4   : > { %1217 = vrot.lane.b32.xlu1 %v1201_v21, %s4637_s26  ;;  %v3976_v30 = vpop.permute.xlu0 %1763  ;;  %v1203_v24 = vadd.f32 %v1187_v38, %v1139_v54  ;;  %v1189_v42 = vadd.f32 %v1173_v5, %v1125_v56  ;;  %v4762_v21 = vld [vmem:[#allocation46_spill] sm:$0xff]  ;;  %v1371_v45 = vmul.f32 %v4765_v29, %v4766_v11  ;;  %v1174_v56 = vmul.f32 %v4761_v10, %v3914_v61  ;;  %v4770_v3 = vld [vmem:[#allocation52_spill] sm:$0xff]  ;;  %v4774_v10 = vld [vmem:[#allocation37_spill] sm:$0xff] }
 0x1f5   : > { %v1259_v57 = vrot.slane %v1255_v25, %v4762_v21  ;;  %vm1699_vm11 = vcmp.lt.s32.totalorder %v3943_v63, 15  ;;  %v4769_v38 = vld [vmem:[#allocation58_spill] sm:$0xff]  ;;  %v4778_v29 = vld [vmem:[#allocation15_spill] sm:$0xff]  ;;  %vm4035_vm13 = vcmp.eq.s32.totalorder %v1263_v9, 1  ;;  %v1507_v63 = vmul.f32 %v4774_v10, %v4747_v49 }
 0x1f6   : > { %v4773_v54 = vld [vmem:[#allocation54_spill] sm:$0xff]  ;;  %v1190_v58 = vadd.f32 %v1174_v56, %v1126_v23  ;;  %v1632_v11 = vmul.f32 %v4778_v29, %v3680_v51  ;;  %v4788_v29 = vld [vmem:[#allocation65_spill] sm:$0xff] }
 0x1f7   : > { %v1400_v43 = vpop.permute.xlu1 %1399  ;;  %1827 = vperm.xlu0 %2705, %v1809_v22   ;;  %v1520_v22 = vmul.f32 %v4767_v1, %v4753_v41  ;;  %vm4029_vm12 = vcmp.eq.s32.totalorder %v1259_v57, 1 }
 0x1f8   : > { %v1428_v46 = vmul.f32 %v1400_v43, %v3986_v47  ;;  %v1429_v16 = vmul.f32 %v1400_v43, %v3990_v12  ;;  %1662 = vrot.lane.b32.xlu1 %v1646_v6, %s2801_s28  ;;  %v1214_v0 = vpop.permute.xlu0 %1213  ;;  %v4772_v6 = vld [vmem:[#allocation73_spill] sm:$0xff]  ;;  %v1506_v43 = vmul.f32 %v4774_v10, %v3553_v48 }
 0x1f9   : > { %v1434_v25 = vmul.f32 %v4772_v6, %v4771_v7  ;;  %v1435_v41 = vmul.f32 %v4772_v6, %v4773_v54  ;;  %v4783_v54 = vld [vmem:[#allocation42_spill] sm:$0xff] }
 0x1fa   : > { %v4002_v34 = vadd.f32 %v1428_v46, %v3880_v39  ;;  %v4005_v26 = vadd.f32 %v1429_v16, %v3882_v36  ;;  %v1322_v39 = vmul.f32 %v4769_v38, %v4768_v15  ;;  %v1323_v36 = vmul.f32 %v4769_v38, %v4770_v3  ;;  %v4775_v46 = vld [vmem:[#allocation13_spill] sm:$0xff] }
 0x1fb   : > { %1205 = vrot.lane.b32.xlu0 %v1189_v42, %s4637_s26  ;;  %v1568_v16 = vmul.f32 %v4775_v46, %v4757_v17  ;;  %v1700_v17 = vsel %vm1699_vm11, 1, %v4760_v55  ;;  %v1989_v42 = vld [vmem:[%s4549_s12 + $0x38] sm:$0xff] }
 0x1fc   : > { %v4022_v5 = vpop.permute.xlu1 %1773  ;;  %1219 = vrot.lane.b32.xlu1 %v1203_v24, %s4637_s26  ;;  %v1386_v1 = vadd.f32 %v1370_v2, %v1322_v39  ;;  %v1387_v15 = vadd.f32 %v1371_v45, %v1323_v36  ;;  %v4781_v24 = vld [vmem:[#allocation40_spill] sm:$0xff]  ;;  %v1230_v7 = vpop.permute.xlu0 %1229  ;;  %v1743_v45 = vld [vmem:[%s4544_s7] sm:$0xff]  ;;  %v1704_v46 = vrot.slane %v1700_v17, %v4762_v21  ;;  %v1708_v49 = vrot.slane %v1700_v17, %v4763_v62  ;;  %v4789_v17 = vld [vmem:[#allocation71_spill] sm:$0xff] }
 0x1fd   : > { %v1554_v48 = vmul.f32 %v4781_v24, %v4748_v50  ;;  %v1584_v3 = vadd.f32 %v1568_v16, %v1520_v22  ;;  %v1242_v51 = vsel %vm1237_vm10, %v1214_v0, %v1230_v7  ;;  %v1250_v9 = vsel %vm1237_vm10, %v1230_v7, %v1214_v0  ;;  %v4782_v50 = vld [vmem:[#allocation64_spill] sm:$0xff]  ;;  %v1807_v7 = vld [vmem:[%s4545_s8] sm:$0xff] }
 0x1fe   : > { %v1450_v23 = vadd.f32 %v1434_v25, %v1386_v1  ;;  %v1451_v57 = vadd.f32 %v1435_v41, %v1387_v15  ;;  %v1274_v56 = vsel %vm4029_vm12, %v1250_v9, 0.0  ;;  %v1275_v39 = vsel %vm4035_vm13, %v1242_v51, 0.0  ;;  %v4791_v9 = vld [vmem:[#allocation72_spill] sm:$0xff] }
 0x1ff   : > { %1221 = vrot.lane.b32.xlu0 %v1190_v58, %s4637_s26  ;;  %v1570_v22 = vadd.f32 %v1554_v48, %v1506_v43  ;;  %v1648_v0 = vadd.f32 %v1632_v11, %v1584_v3  ;;  %v1555_v25 = vmul.f32 %v4781_v24, %v4749_v60  ;;  %v1618_v41 = vmul.f32 %v4783_v54, %v3895_v53  ;;  %v1983_v60 = vld [vmem:[%s4549_s12 + $0x8] sm:$0xff] }
 0x200   : > { %v4049_v2 = vpop.permute.xlu1 %1842  ;;  %1235 = vrot.lane.b32.xlu1 %v4782_v50, %s4637_s26  ;;  %v1466_v36 = vadd.f32 %v1450_v23, %v1274_v56  ;;  %v1467_v6 = vadd.f32 %v1451_v57, %v1275_v39  ;;  %v1619_v58 = vmul.f32 %v4783_v54, %v3914_v61  ;;  %vm4074_vm15 = vcmp.eq.s32.totalorder %v1704_v46, 1  ;;  %v1675_v21 = vpop.permute.xlu0 %1674  ;;  %v4790_v57 = vld [vmem:[#allocation35_spill] sm:$0xff]  ;;  %v4794_v54 = vld [vmem:[#allocation41_spill] sm:$0xff]  ;;  %v4795_v46 = vld [vmem:[#allocation44_spill] sm:$0xff] }
 0x201   : > { %v1571_v43 = vadd.f32 %v1555_v25, %v1507_v63  ;;  %v1634_v16 = vadd.f32 %v1618_v41, %v1570_v22  ;;  %vm4078_vm0 = vcmp.eq.s32.totalorder %v1708_v49, 1  ;;  %v1063_v23 = vmul.f32 %v3867_v35, %v3566_v28  ;;  %v4792_v63 = vld [vmem:[#allocation34_spill] sm:$0xff] }
 0x202   : > { %v1111_v51 = vmul.f32 %v4790_v57, %v4742_v37  ;;  %v1064_v50 = vmul.f32 %v3867_v35, %v3570_v13  ;;  %v1175_v22 = vmul.f32 %v4792_v63, %v3986_v47  ;;  %v1744_v35 = vld [vmem:[%s4544_s7 + $0x8] sm:$0xff]  ;;  %v1556_v41 = vmul.f32 %v4794_v54, %v4742_v37 }
 0x203   : > { %1753 = vperm.xlu0 %2705, %v1743_v45   ;;  %v1635_v1 = vadd.f32 %v1619_v58, %v1571_v43  ;;  %v1112_v45 = vmul.f32 %v4790_v57, %v4743_v4  ;;  %v1620_v49 = vmul.f32 %v4795_v46, %v3986_v47  ;;  %v1621_v58 = vmul.f32 %v4795_v46, %v3990_v12  ;;  %v1808_v37 = vld [vmem:[%s4545_s8 + $0x8] sm:$0xff]  ;;  %v4801_v57 = vld [vmem:[#allocation74_spill] sm:$0xff] }
 0x204   : > { %v4068_v10 = vpop.permute.xlu1 %1768  ;;  %1664 = vrot.lane.b32.xlu1 %v1648_v0, %s2801_s28  ;;  %v1176_v0 = vmul.f32 %v4792_v63, %v3990_v12  ;;  %v4796_v47 = vld [vmem:[#allocation19_spill] sm:$0xff] }
 0x205   : > { %v1128_v56 = vadd.f32 %v1112_v45, %v1064_v50  ;;  %v4802_v46 = vld [vmem:[#allocation75_spill] sm:$0xff] }
 0x207   : > { %1650 = vrot.lane.b32.xlu0 %v1634_v16, %s2801_s28 }
 0x208   : > { %v1659_v62 = vpop.permute.xlu1 %1658  ;;  %1680 = vrot.lane.b32.xlu1 %v4788_v29, %s2801_s28 }
 0x209   : > { %v1687_v11 = vsel %vm1682_vm14, %v1659_v62, %v1675_v21  ;;  %v1695_v61 = vsel %vm1682_vm14, %v1675_v21, %v1659_v62 }
 0x20a   : > { %v1719_v15 = vsel %vm4074_vm15, %v1687_v11, 0.0  ;;  %v1720_v24 = vsel %vm4078_vm0, %v1695_v61, 0.0  ;;  %v4797_v11 = vld [vmem:[#allocation70_spill] sm:$0xff] }
 0x20b   : > { %v4093_v48 = vadd.f32 %v1719_v15, %v1466_v36  ;;  %v4095_v3 = vadd.f32 %v1720_v24, %v1467_v6  ;;  %1666 = vrot.lane.b32.xlu0 %v1635_v1, %s2801_s28  ;;  %v1192_v36 = vadd.f32 %v1176_v0, %v1128_v56  ;;  %v4793_v6 = vld [vmem:[#allocation39_spill] sm:$0xff]  ;;  %v1372_v61 = vmul.f32 %v4797_v11, %v4796_v47  ;;  %v4798_v15 = vld [vmem:[#allocation50_spill] sm:$0xff]  ;;  %v4799_v24 = vld [vmem:[#allocation68_spill] sm:$0xff] }
 0x20c   : > { %1211 = vrot.lane.b32.xlu1 %v3869_v27, %s4637_s26  ;;  %v1810_v27 = vld [vmem:[%s4545_s8 + $0x18] sm:$0xff]  ;;  %v1508_v25 = vmul.f32 %v4793_v6, %v3566_v28  ;;  %v1509_v43 = vmul.f32 %v4793_v6, %v3570_v13  ;;  %v1557_v28 = vmul.f32 %v4794_v54, %v4743_v4  ;;  %v1373_v4 = vmul.f32 %v4797_v11, %v4736_v19 }
 0x20e   : > { %v1572_v16 = vadd.f32 %v1556_v41, %v1508_v25  ;;  %v1573_v62 = vadd.f32 %v1557_v28, %v1509_v43  ;;  %v4803_v43 = vld [vmem:[#allocation76_spill] sm:$0xff] }
 0x20f   : > { %1817 = vperm.xlu0 %2705, %v1807_v7   ;;  %v1324_v7 = vmul.f32 %v4799_v24, %v4798_v15 }
 0x210   : > { %1227 = vrot.lane.b32.xlu1 %v3871_v20, %s4637_s26  ;;  %v1127_v20 = vadd.f32 %v1111_v51, %v1063_v23  ;;  %v1636_v21 = vadd.f32 %v1620_v49, %v1572_v16  ;;  %v1637_v29 = vadd.f32 %v1621_v58, %v1573_v62  ;;  %v4800_v23 = vld [vmem:[#allocation77_spill] sm:$0xff] }
 0x211   : > { %v1436_v51 = vmul.f32 %v4801_v57, %v4800_v23 }
 0x212   : > { %v1191_v39 = vadd.f32 %v1175_v22, %v1127_v20 }
 0x214   : > { %1656 = vrot.lane.b32.xlu1 %v4789_v17, %s2801_s28  ;;  %v1325_v17 = vmul.f32 %v4799_v24, %v4732_v8 }
 0x216   : > { %v1389_v50 = vadd.f32 %v1373_v4, %v1325_v17 }
 0x218   : > { %1672 = vrot.lane.b32.xlu1 %v4791_v9, %s2801_s28  ;;  %v1437_v9 = vmul.f32 %v4801_v57, %v3815_v44 }
 0x21a   : > { %v1453_v19 = vadd.f32 %v1437_v9, %v1389_v50  ;;  %v4804_v9 = vld [vmem:[#allocation61_spill] sm:$0xff]  ;;  %v4805_v50 = vld [vmem:[#allocation62_spill] sm:$0xff] }
 0x21c   : > { %1832 = vperm.xlu1 %2707, %v1810_v27   ;;  %v1388_v27 = vadd.f32 %v1372_v61, %v1324_v7 }
 0x21e   : > { %v1452_v63 = vadd.f32 %v1436_v51, %v1388_v27 }
 0x220   : > { %1207 = vrot.lane.b32.xlu1 %v1191_v39, %s4637_s26 }
 0x224   : > { %1223 = vrot.lane.b32.xlu1 %v1192_v36, %s4637_s26 }
 0x228   : > { %1758 = vperm.xlu1 %2707, %v1744_v35  }
 0x22c   : > { %1652 = vrot.lane.b32.xlu1 %v1636_v21, %s2801_s28 }
 0x230   : > { %1668 = vrot.lane.b32.xlu1 %v1637_v29, %s2801_s28  ;;  %s4487_s28 = scalar_lea.hbm %s4553_s16, %s2568_s19  ;;  %s2733_s19 = scalar_lea.vmem %s2732_s18, 2048 }
 0x231   : > { %p2735_p1 = scmp.lt.s32.totalorder %s2733_s19, %s2727_s17 }
 0x233   : > { %p2736_p2 = por %p2735_p1, %p2734_p0 }
 0x234   : > { %1822 = vperm.xlu1 %2707, %v1808_v37  }
 0x235   : > { %p2737_p3 = pnand %p2736_p2, %p2730_p13 }
 0x251   : > { %v1234_v13 = vpop.permute.xlu0 %1233 }
 0x255   : > { %v1679_v12 = vpop.permute.xlu0 %1678 }
 0x256   : > { %v1216_v1 = vpop.permute.xlu1 %1215 }
 0x259   : > { %v1210_v20 = vpop.permute.xlu0 %1209 }
 0x25a   : > { %v1232_v45 = vpop.permute.xlu1 %1231 }
 0x25b   : > { %v1243_v22 = vsel %vm1237_vm10, %v1216_v1, %v1232_v45  ;;  %v1251_v56 = vsel %vm1237_vm10, %v1232_v45, %v1216_v1 }
 0x25c   : > { %v1276_v8 = vsel %vm4029_vm12, %v1251_v56, 0.0  ;;  %v1277_v39 = vsel %vm4035_vm13, %v1243_v22, 0.0 }
 0x25d   : > { %v1468_v0 = vadd.f32 %v1452_v63, %v1276_v8  ;;  %v1469_v44 = vadd.f32 %v1453_v19, %v1277_v39  ;;  %v1226_v36 = vpop.permute.xlu0 %1225 }
 0x25e   : > { %v1661_v6 = vpop.permute.xlu1 %1660  ;;  %v1240_v25 = vsel %vm1237_vm10, %v1210_v20, %v1226_v36  ;;  %v1248_v35 = vsel %vm1237_vm10, %v1226_v36, %v1210_v20  ;;  %v1799_v36 = vmul.f32 %v4022_v5, %v4093_v48 }
 0x25f   : > { %v1270_v54 = vsel %vm4029_vm12, %v1248_v35, 0.0  ;;  %v1271_v41 = vsel %vm4035_vm13, %v1240_v25, 0.0 }
 0x260   : > { %v1462_v49 = vadd.f32 %v4802_v46, %v1270_v54  ;;  %v1463_v16 = vadd.f32 %v4803_v43, %v1271_v41  ;;  %v1800_v54 = vmul.f32 %v4022_v5, %v4095_v3  ;;  %v4229_v5 = vadd.f32 %v3938_v14, %v1799_v36 }
 0x261   : > { %v1655_v28 = vpop.permute.xlu0 %1654 }
 0x262   : > { %v1677_v58 = vpop.permute.xlu1 %1676 }
 0x263   : > { %v1688_v21 = vsel %vm1682_vm14, %v1661_v6, %v1677_v58  ;;  %v1696_v62 = vsel %vm1682_vm14, %v1677_v58, %v1661_v6  ;;  %v4806_v6 = vld [vmem:[#allocation20_spill] sm:$0xff]  ;;  %v4238_v58 = vadd.f32 %v3938_v14, %v1800_v54 }
 0x264   : > { %v1721_v29 = vsel %vm4074_vm15, %v1688_v21, 0.0  ;;  %v1722_v37 = vsel %vm4078_vm0, %v1696_v62, 0.0  ;;  %v4807_v21 = vld [vmem:[#allocation66_spill] sm:$0xff] }
 0x265   : > { %v1737_v47 = vadd.f32 %v1721_v29, %v1468_v0  ;;  %v1738_v11 = vadd.f32 %v1722_v37, %v1469_v44  ;;  %v1671_v61 = vpop.permute.xlu0 %1670  ;;  %v4808_v29 = vld [vmem:[#allocation67_spill] sm:$0xff] }
 0x266   : > { %v1218_v4 = vpop.permute.xlu1 %1217  ;;  %v1685_v1 = vsel %vm1682_vm14, %v1655_v28, %v1671_v61  ;;  %v1693_v15 = vsel %vm1682_vm14, %v1671_v61, %v1655_v28 }
 0x267   : > { %v1244_v24 = vsel %vm1237_vm10, %v1218_v4, %v1234_v13  ;;  %v1252_v7 = vsel %vm1237_vm10, %v1234_v13, %v1218_v4  ;;  %v1715_v57 = vsel %vm4074_vm15, %v1685_v1, 0.0  ;;  %v1716_v51 = vsel %vm4078_vm0, %v1693_v15, 0.0 }
 0x268   : > { %v1278_v17 = vsel %vm4029_vm12, %v1252_v7, 0.0  ;;  %v1279_v23 = vsel %vm4035_vm13, %v1244_v24, 0.0  ;;  %v1731_v45 = vadd.f32 %v1715_v57, %v1462_v49  ;;  %v1732_v63 = vadd.f32 %v1716_v51, %v1463_v16 }
 0x269   : > { %v1470_v27 = vadd.f32 %v4804_v9, %v1278_v17  ;;  %v1471_v20 = vadd.f32 %v4805_v50, %v1279_v23  ;;  %v1801_v46 = vmul.f32 %v3922_v31, %v1737_v47  ;;  %v1802_v49 = vmul.f32 %v3922_v31, %v1738_v11 }
 0x26a   : > { %v1663_v19 = vpop.permute.xlu1 %1662  ;;  %v1883_v1 = vadd.f32 %v4238_v58, %v4229_v5 }
 0x26b   : > { %v1689_v13 = vsel %vm1682_vm14, %v1663_v19, %v1679_v12  ;;  %v1697_v22 = vsel %vm1682_vm14, %v1679_v12, %v1663_v19  ;;  %v4243_v61 = vadd.f32 %v4049_v2, %v1801_v46  ;;  %v4246_v4 = vadd.f32 %v4049_v2, %v1802_v49  ;;  %v4810_v49 = vld [vmem:[#allocation79_spill] sm:$0xff] }
 0x26c   : > { %v1723_v56 = vsel %vm4074_vm15, %v1689_v13, 0.0  ;;  %v1724_v8 = vsel %vm4078_vm0, %v1697_v22, 0.0 }
 0x26d   : > { %v1739_v39 = vadd.f32 %v1723_v56, %v1470_v27  ;;  %v1740_v0 = vadd.f32 %v1724_v8, %v1471_v20  ;;  %v1886_v24 = vadd.f32 %v4246_v4, %v4243_v61 }
 0x26e   : > { %v1220_v44 = vpop.permute.xlu1 %1219 }
 0x26f   : > { %v1803_v25 = vmul.f32 %v4806_v6, %v1739_v39  ;;  %v1804_v35 = vmul.f32 %v4806_v6, %v1740_v0  ;;  %v1795_v0 = vmul.f32 %v3976_v30, %v1731_v45 }
 0x271   : > { %v4217_v12 = vadd.f32 %v3928_v59, %v1803_v25  ;;  %v4220_v41 = vadd.f32 %v3928_v59, %v1804_v35 }
 0x272   : > { %v1236_v43 = vpop.permute.xlu1 %1235  ;;  %v1828_v16 = vpop.permute.xlu0 %1827 }
 0x273   : > { %v1245_v48 = vsel %vm1237_vm10, %v1220_v44, %v1236_v43  ;;  %v1253_v28 = vsel %vm1237_vm10, %v1236_v43, %v1220_v44  ;;  %v1889_v31 = vadd.f32 %v4220_v41, %v4217_v12  ;;  %v1796_v44 = vmul.f32 %v3976_v30, %v1732_v63  ;;  %v4809_v63 = vld [vmem:[#allocation78_spill] sm:$0xff] }
 0x274   : > { %v1280_v3 = vsel %vm4029_vm12, %v1253_v28, 0.0  ;;  %v1281_v59 = vsel %vm4035_vm13, %v1245_v48, 0.0 }
 0x275   : > { %v1472_v62 = vadd.f32 %v4807_v21, %v1280_v3  ;;  %v1473_v37 = vadd.f32 %v4808_v29, %v1281_v59  ;;  %1890 = vadd.xlane.f32.xlu0 %v1889_v31  ;;  %v4282_v35 = vadd.f32 %v1828_v16, %v1796_v44 }
 0x276   : > { %v1665_v47 = vpop.permute.xlu1 %1664  ;;  %v1206_v11 = vpop.permute.xlu0 %1205 }
 0x279   : > { %1884 = vadd.xlane.f32.xlu0 %v1883_v1 }
 0x27a   : > { %v1681_v15 = vpop.permute.xlu1 %1680  ;;  %v1222_v14 = vpop.permute.xlu0 %1221 }
 0x27b   : > { %v1690_v7 = vsel %vm1682_vm14, %v1665_v47, %v1681_v15  ;;  %v1698_v17 = vsel %vm1682_vm14, %v1681_v15, %v1665_v47  ;;  %v1238_v23 = vsel %vm1237_vm10, %v1206_v11, %v1222_v14  ;;  %v1246_v2 = vsel %vm1237_vm10, %v1222_v14, %v1206_v11 }
 0x27c   : > { %v1725_v57 = vsel %vm4074_vm15, %v1690_v7, 0.0  ;;  %v1726_v51 = vsel %vm4078_vm0, %v1698_v17, 0.0  ;;  %v1266_v9 = vsel %vm4029_vm12, %v1246_v2, 0.0  ;;  %v1267_v27 = vsel %vm4035_vm13, %v1238_v23, 0.0 }
 0x27d   : > { %v1741_v50 = vadd.f32 %v1725_v57, %v1472_v62  ;;  %v1742_v20 = vadd.f32 %v1726_v51, %v1473_v37  ;;  %v1458_v19 = vadd.f32 %v3930_v18, %v1266_v9  ;;  %v1459_v13 = vadd.f32 %v3932_v33, %v1267_v27  ;;  %1887 = vadd.xlane.f32.xlu0 %v1886_v24 }
 0x27e   : > { %v1212_v22 = vpop.permute.xlu1 %1211  ;;  %v1754_v56 = vpop.permute.xlu0 %1753  ;;  %v4280_v18 = vadd.f32 %v1828_v16, %v1795_v0  ;;  %v2802_v9 = vmov 0.0  }
 0x27f   : > { %v1805_v8 = vmul.f32 %v3898_v32, %v1741_v50  ;;  %v1806_v39 = vmul.f32 %v3898_v32, %v1742_v20  ;;  %2579 = vmatprep.subr.bf16.mxu1 %v2802_v9  ;;  %2587 = vmatprep.mubr.msk.bf16.mxu1 %vm2803_vm1, %v2802_v9 }
 0x280   : > { %v1877_v28 = vadd.f32 %v4282_v35, %v4280_v18 }
 0x281   : > { %v4275_v36 = vadd.f32 %v3950_v40, %v1805_v8  ;;  %v4278_v6 = vadd.f32 %v3950_v40, %v1806_v39  ;;  %v1909_v39 = vld [vmem:[%s4547_s10] sm:$0xff] }
 0x282   : > { %v1228_v33 = vpop.permute.xlu1 %1227  ;;  %v1651_v25 = vpop.permute.xlu0 %1650 }
 0x283   : > { %v1241_v54 = vsel %vm1237_vm10, %v1212_v22, %v1228_v33  ;;  %v1249_v32 = vsel %vm1237_vm10, %v1228_v33, %v1212_v22  ;;  %v1892_v30 = vadd.f32 %v4278_v6, %v4275_v36 }
 0x284   : > { %v1272_v45 = vsel %vm4029_vm12, %v1249_v32, 0.0  ;;  %v1273_v40 = vsel %vm4035_vm13, %v1241_v54, 0.0 }
 0x285   : > { %v1464_v46 = vadd.f32 %v4809_v63, %v1272_v45  ;;  %v1465_v43 = vadd.f32 %v4810_v49, %v1273_v40  ;;  %1893 = vadd.xlane.f32.xlu1 %v1892_v30  ;;  %v1988_v30 = vld [vmem:[%s4549_s12 + $0x30] sm:$0xff] }
 0x286   : > { %v1657_v16 = vpop.permute.xlu1 %1656  ;;  %v1667_v48 = vpop.permute.xlu0 %1666 }
 0x287   : > { %v1683_v3 = vsel %vm1682_vm14, %v1651_v25, %v1667_v48  ;;  %v1691_v59 = vsel %vm1682_vm14, %v1667_v48, %v1651_v25 }
 0x288   : > { %v1711_v31 = vsel %vm4074_vm15, %v1683_v3, 0.0  ;;  %v1712_v21 = vsel %vm4078_vm0, %v1691_v59, 0.0 }
 0x289   : > { %v1727_v62 = vadd.f32 %v1711_v31, %v1458_v19  ;;  %v1728_v29 = vadd.f32 %v1712_v21, %v1459_v13  ;;  %1878 = vadd.xlane.f32.xlu1 %v1877_v28  ;;  %v1910_v31 = vld [vmem:[%s4547_s10 + $0x8] sm:$0xff]  ;;  %v1986_v21 = vld [vmem:[%s4549_s12 + $0x20] sm:$0xff] }
 0x28a   : > { %v1673_v37 = vpop.permute.xlu1 %1672  ;;  %v1818_v7 = vpop.permute.xlu0 %1817 }
 0x28b   : > { %v1686_v47 = vsel %vm1682_vm14, %v1657_v16, %v1673_v37  ;;  %v1694_v11 = vsel %vm1682_vm14, %v1673_v37, %v1657_v16  ;;  %v1791_v1 = vmul.f32 %v1754_v56, %v1727_v62  ;;  %v1792_v15 = vmul.f32 %v1754_v56, %v1728_v29  ;;  %v1985_v16 = vld [vmem:[%s4549_s12 + $0x18] sm:$0xff]  ;;  %v1984_v62 = vld [vmem:[%s4549_s12 + $0x10] sm:$0xff]  ;;  %v1982_v29 = vld [vmem:[%s4549_s12] sm:$0xff] }
 0x28c   : > { %v1717_v14 = vsel %vm4074_vm15, %v1686_v47, 0.0  ;;  %v1718_v24 = vsel %vm4078_vm0, %v1694_v11, 0.0 }
 0x28d   : > { %v1733_v17 = vadd.f32 %v1717_v14, %v1464_v46  ;;  %v1734_v23 = vadd.f32 %v1718_v24, %v1465_v43  ;;  %v4314_v2 = vadd.f32 %v1818_v7, %v1791_v1  ;;  %v4316_v57 = vadd.f32 %v1818_v7, %v1792_v15 }
 0x28f   : > { %v1871_v51 = vadd.f32 %v4316_v57, %v4314_v2  ;;  %v1797_v27 = vmul.f32 %v4068_v10, %v1733_v17  ;;  %v1798_v50 = vmul.f32 %v4068_v10, %v1734_v23 }
 0x291   : > { %1872 = vadd.xlane.f32.xlu1 %v1871_v51 }
 0x297   : > { %v1833_v20 = vpop.permute.xlu1 %1832 }
 0x298   : > { %v4323_v19 = vadd.f32 %v1833_v20, %v1797_v27  ;;  %v4325_v13 = vadd.f32 %v1833_v20, %v1798_v50 }
 0x29a   : > { %v1880_v22 = vadd.f32 %v4325_v13, %v4323_v19 }
 0x29b   : > { %v1208_v56 = vpop.permute.xlu1 %1207 }
 0x29c   : > { %1881 = vadd.xlane.f32.xlu0 %v1880_v22 }
 0x29f   : > { %v1224_v8 = vpop.permute.xlu1 %1223 }
 0x2a0   : > { %v1239_v0 = vsel %vm1237_vm10, %v1208_v56, %v1224_v8  ;;  %v1247_v10 = vsel %vm1237_vm10, %v1224_v8, %v1208_v56 }
 0x2a1   : > { %v1268_v44 = vsel %vm4029_vm12, %v1247_v10, 0.0  ;;  %v1269_v33 = vsel %vm4035_vm13, %v1239_v0, 0.0 }
 0x2a2   : > { %v1460_v25 = vadd.f32 %v4002_v34, %v1268_v44  ;;  %v1461_v54 = vadd.f32 %v4005_v26, %v1269_v33  ;;  %1913 = vperm.xlu1 %2707, %v1909_v39   ;;  %v1987_v34 = vld [vmem:[%s4549_s12 + $0x28] sm:$0xff]  ;;  %v2712_v44 = vld [vmem:[%s4546_s9] sm:$0xff]  }
 0x2a3   : > { %v1759_v32 = vpop.permute.xlu1 %1758  ;;  %v2713_v33 = vld [vmem:[%s4548_s11] sm:$0xff]  }
 0x2a6   : > { %2022 = vperm.xlu1 %2707, %v1988_v30  }
 0x2a7   : > { %v1653_v45 = vpop.permute.xlu1 %1652 }
 0x2aa   : > { %2027 = vperm.xlu1 %2707, %v1989_v42  }
 0x2ab   : > { %v1669_v40 = vpop.permute.xlu1 %1668 }
 0x2ac   : > { %v1684_v26 = vsel %vm1682_vm14, %v1653_v45, %v1669_v40  ;;  %v1692_v38 = vsel %vm1682_vm14, %v1669_v40, %v1653_v45 }
 0x2ad   : > { %v1713_v63 = vsel %vm4074_vm15, %v1684_v26, 0.0  ;;  %v1714_v46 = vsel %vm4078_vm0, %v1692_v38, 0.0 }
 0x2ae   : > { %v1729_v49 = vadd.f32 %v1713_v63, %v1460_v25  ;;  %v1730_v43 = vadd.f32 %v1714_v46, %v1461_v54  ;;  %2017 = vperm.xlu1 %2707, %v1987_v34   ;;  %v2714_v63 = vld [vmem:[%s4548_s11 + $0x8] sm:$0xff]   ;;  %v2715_v46 = vld [vmem:[%s4548_s11 + $0x10] sm:$0xff]  }
 0x2af   : > { %v1823_v3 = vpop.permute.xlu1 %1822 }
 0x2b0   : > { %v1793_v48 = vmul.f32 %v1759_v32, %v1729_v49  ;;  %v1794_v28 = vmul.f32 %v1759_v32, %v1730_v43  ;;  %v2716_v49 = vld [vmem:[%s4548_s11 + $0x18] sm:$0xff]  }
 0x2b2   : > { %v4362_v59 = vadd.f32 %v1823_v3, %v1793_v48  ;;  %v4364_v52 = vadd.f32 %v1823_v3, %v1794_v28  ;;  %2007 = vperm.xlu1 %2707, %v1985_v16  }
 0x2b4   : > { %v1874_v53 = vadd.f32 %v4364_v52, %v4362_v59 }
 0x2b6   : > { %1875 = vadd.xlane.f32.xlu0 %v1874_v53  ;;  %1997 = vperm.xlu1 %2707, %v1983_v60  }
 0x2cc   : > { %1918 = vperm.xlu0 %2705, %v1910_v31  }
 0x2d0   : > { %2012 = vperm.xlu0 %2705, %v1986_v21  }
 0x2d4   : > { %2002 = vperm.xlu0 %2705, %v1984_v62  }
 0x2d8   : > { %1992 = vperm.xlu0 %2705, %v1982_v29  }
 0x2fe   : > { %v1891_v37 = vpop.xlane.xlu0 %1890 }
 0x2ff   : > { %v1901_v15 = vmul.f32 0.00390625, %v1891_v37 }
 0x302   : > { %v1885_v47 = vpop.xlane.xlu0 %1884 }
 0x303   : > { %v1899_v17 = vmul.f32 0.00390625, %v1885_v47 }
 0x306   : > { %v1888_v11 = vpop.xlane.xlu0 %1887 }
 0x307   : > { %v1900_v24 = vmul.f32 0.00390625, %v1888_v11 }
 0x309   : > { %v1905_v23 = vpack.c.bf16 %v1900_v24, %v1899_v17 }
 0x30e   : > { %v1894_v1 = vpop.xlane.xlu1 %1893 }
 0x30f   : > { %v1902_v14 = vmul.f32 0.00390625, %v1894_v1 }
 0x311   : > { %v1906_v7 = vpack.c.bf16 %v1902_v14, %v1901_v15 }
 0x312   : > { %v1879_v51 = vpop.xlane.xlu1 %1878 }
 0x313   : > { %2580 = vmatpush3.bf16.msra.mxu1 %v1906_v7  ;;  %v1897_v50 = vmul.f32 0.00390625, %v1879_v51 }
 0x314   : > { %2581 = vmatprep.subr.bf16.mxu1 %v2802_v9 }
 0x317   : > { %2582 = vmatpush3.bf16.msra.mxu1 %v1905_v23 }
 0x318   : > { %2583 = vmatprep.subr.bf16.mxu1 %v2802_v9 }
 0x31a   : > { %v1873_v56 = vpop.xlane.xlu1 %1872 }
 0x31b   : > { %v1895_v39 = vmul.f32 0.00390625, %v1873_v56 }
 0x31e   : > { %v1914_v25 = vpop.permute.xlu1 %1913 }
 0x322   : > { %v2023_v43 = vpop.permute.xlu1 %2022 }
 0x325   : > { %v1882_v27 = vpop.xlane.xlu0 %1881 }
 0x326   : > { %v1898_v20 = vmul.f32 0.00390625, %v1882_v27  ;;  %v2028_v16 = vpop.permute.xlu1 %2027 }
 0x328   : > { %v1904_v22 = vpack.c.bf16 %v1898_v20, %v1897_v50 }
 0x32a   : > { %2584 = vmatpush3.bf16.msra.mxu1 %v1904_v22  ;;  %v2018_v60 = vpop.permute.xlu1 %2017 }
 0x32b   : > { %2585 = vmatprep.subr.bf16.mxu1 %v2802_v9 }
 0x32e   : > { %v2008_v29 = vpop.permute.xlu1 %2007 }
 0x33f   : > { %v1876_v8 = vpop.xlane.xlu0 %1875 }
 0x340   : > { %v1896_v0 = vmul.f32 0.00390625, %v1876_v8 }
 0x342   : > { %v1903_v10 = vpack.c.bf16 %v1896_v0, %v1895_v39  ;;  %v1998_v39 = vpop.permute.xlu1 %1997 }
 0x344   : > { %2586 = vmatpush3.bf16.msra.mxu1 %v1903_v10 }
 0x347   : > { %2588 = vmatmul.mubr.msk.bf16.vlgmr.msra.gmra.mxu1 %vm1926_vm2, %v2712_v44  ;;  %v1919_v30 = vpop.permute.xlu0 %1918 }
 0x348   : > { %2593 = vmatprep.mubr.msk.bf16.mxu1 %vm2050_vm3, %v2713_v33 }
 0x34b   : > { %v2013_v28 = vpop.permute.xlu0 %2012 }
 0x34f   : > { %v2003_v21 = vpop.permute.xlu0 %2002 }
 0x353   : > { %v1993_v24 = vpop.permute.xlu0 %1992 }
 0x407   : > { %v1964_v9 = vpop.f32.mrf.mxu1 }
 0x408   : > { %v1965_v32 = vadd.f32 %v1964_v9, %v1914_v25 }
 0x409   : > { %v2589_v54 = vpop.f32.mrf.mxu1 }
 0x40a   : > { %v1971_v34 = vmax.f32 %v1965_v32, 0.0 }
 0x40b   : > { %v1967_v45 = vpop.f32.mrf.mxu1 }
 0x40c   : > { %v1968_v42 = vadd.f32 %v1967_v45, %v1919_v30 }
 0x40d   : > { %v2590_v40 = vpop.f32.mrf.mxu1 }
 0x40e   : > { %v1972_v26 = vmax.f32 %v1968_v42, 0.0 }
 0x410   : > { %v1973_v38 = vpack.c.bf16 %v1972_v26, %v1971_v34 }
 0x412   : > { %2591 = vmatprep.subr.bf16.mxu1 %v1973_v38 }
 0x413   : > { %2592 = vmatpush3.bf16.msra.mxu1 %v1973_v38 }
 0x416   : > { %2594 = vmatmul.mubr.msk.bf16.vlgmr.msra.gmra.mxu1 %vm2050_vm3, %v2714_v63 }
 0x417   : > { %2597 = vmatprep.mubr.msk.bf16.mxu1 %vm2050_vm3, %v2715_v46 }
 0x41e   : > { %2598 = vmatmul.mubr.msk.bf16.gmra.mxu1 %vm2050_vm3, %v2716_v49 }
 0x4d6   : > { %v2595_v48 = vpop.f32.mrf.mxu1 }
 0x4d7   : > { %v2106_v37 = vadd.f32 %v2595_v48, %v2003_v21 }
 0x4d8   : > { %v2097_v3 = vpop.f32.mrf.mxu1 }
 0x4d9   : > { %v2130_v51 = vadd.f32 3.0, %v2106_v37  ;;  %v2098_v27 = vadd.f32 %v2097_v3, %v1993_v24  ;;  %v2379_v37 = vld [vmem:[%s4551_s14 + $0x10] sm:$0xff] }
 0x4da   : > { %v2596_v53 = vpop.f32.mrf.mxu1 }
 0x4db   : > { %v2109_v7 = vadd.f32 %v2596_v53, %v2008_v29  ;;  %v2138_v25 = vmax.f32 %v2130_v51, 0.0  ;;  %v2128_v54 = vadd.f32 3.0, %v2098_v27  ;;  %v2378_v29 = vld [vmem:[%s4551_s14 + $0x8] sm:$0xff] }
 0x4dc   : > { %v2100_v31 = vpop.f32.mrf.mxu1 }
 0x4dd   : > { %v2131_v10 = vadd.f32 3.0, %v2109_v7  ;;  %v2101_v44 = vadd.f32 %v2100_v31, %v1998_v39  ;;  %v2146_v63 = vmin.f32 %v2138_v25, 6.0  ;;  %v2136_v46 = vmax.f32 %v2128_v54, 0.0 }
 0x4de   : > { %v2599_v62 = vpop.f32.mrf.mxu1 }
 0x4df   : > { %v2122_v47 = vadd.f32 %v2599_v62, %v2023_v43  ;;  %v2139_v40 = vmax.f32 %v2131_v10, 0.0  ;;  %v2129_v34 = vadd.f32 3.0, %v2101_v44  ;;  %v2144_v3 = vmin.f32 %v2136_v46, 6.0  ;;  %v2377_v62 = vld [vmem:[%s4551_s14] sm:$0xff] }
 0x4e0   : > { %v2113_v11 = vpop.f32.mrf.mxu1 }
 0x4e1   : > { %v2114_v1 = vadd.f32 %v2113_v11, %v2013_v28  ;;  %v2134_v15 = vadd.f32 3.0, %v2122_v47  ;;  %v2147_v43 = vmin.f32 %v2139_v40, 6.0  ;;  %v2154_v28 = vmul.f32 0.16666667, %v2146_v63  ;;  %v2380_v47 = vld [vmem:[%s4551_s14 + $0x18] sm:$0xff]  ;;  %v2409_v11 = vld [vmem:[%s4552_s15] sm:$0xff] }
 0x4e2   : > { %v2600_v14 = vpop.f32.mrf.mxu1  ;;  %v2152_v31 = vmul.f32 0.16666667, %v2144_v3 }
 0x4e3   : > { %v2132_v17 = vadd.f32 3.0, %v2114_v1  ;;  %v2125_v23 = vadd.f32 %v2600_v14, %v2028_v16  ;;  %v2142_v50 = vmax.f32 %v2134_v15, 0.0  ;;  %v2137_v16 = vmax.f32 %v2129_v34, 0.0  ;;  %v2410_v1 = vld [vmem:[%s4552_s15 + $0x8] sm:$0xff]  ;;  %v2411_v15 = vld [vmem:[%s4552_s15 + $0x10] sm:$0xff]  ;;  %v2412_v14 = vld [vmem:[%s4552_s15 + $0x18] sm:$0xff] }
 0x4e4   : > { %v2116_v20 = vpop.f32.mrf.mxu1 }
 0x4e5   : > { %v2140_v22 = vmax.f32 %v2132_v17, 0.0  ;;  %v2135_v56 = vadd.f32 3.0, %v2125_v23  ;;  %v2117_v8 = vadd.f32 %v2116_v20, %v2018_v60  ;;  %v2150_v0 = vmin.f32 %v2142_v50, 6.0 }
 0x4e6   : > { %v2155_v60 = vmul.f32 0.16666667, %v2147_v43  ;;  %v2145_v53 = vmin.f32 %v2137_v16, 6.0 }
 0x4e7   : > { %v2143_v33 = vmax.f32 %v2135_v56, 0.0  ;;  %v2133_v9 = vadd.f32 3.0, %v2117_v8  ;;  %v2158_v32 = vmul.f32 0.16666667, %v2150_v0  ;;  %v2148_v30 = vmin.f32 %v2140_v22, 6.0 }
 0x4e8   : > { %v2153_v21 = vmul.f32 0.16666667, %v2145_v53 }
 0x4e9   : > { %v2151_v45 = vmin.f32 %v2143_v33, 6.0  ;;  %v2141_v42 = vmax.f32 %v2133_v9, 0.0  ;;  %2192 = vperm.xlu0 %2705, %v2158_v32   ;;  %v2156_v49 = vmul.f32 0.16666667, %v2148_v30 }
 0x4eb   : > { %v2159_v26 = vmul.f32 0.16666667, %v2151_v45  ;;  %v2149_v38 = vmin.f32 %v2141_v42, 6.0 }
 0x4ed   : > { %2197 = vperm.xlu1 %2707, %v2159_v26   ;;  %2182 = vperm.xlu0 %2705, %v2156_v49   ;;  %v2157_v48 = vmul.f32 0.16666667, %v2149_v38 }
 0x4f1   : > { %2187 = vperm.xlu1 %2707, %v2157_v48   ;;  %2172 = vperm.xlu0 %2705, %v2154_v28  }
 0x4f5   : > { %2177 = vperm.xlu1 %2707, %v2155_v60   ;;  %2162 = vperm.xlu0 %2705, %v2152_v31  }
 0x4f9   : > { %2167 = vperm.xlu1 %2707, %v2153_v21   ;;  %2383 = vperm.xlu0 %2705, %v2377_v62  }
 0x4fd   : > { %2388 = vperm.xlu1 %2707, %v2378_v29   ;;  %2393 = vperm.xlu0 %2705, %v2379_v37  }
 0x501   : > { %2398 = vperm.xlu1 %2707, %v2380_v47   ;;  %2415 = vperm.xlu0 %2705, %v2409_v11  }
 0x505   : > { %2420 = vperm.xlu1 %2707, %v2410_v1   ;;  %2425 = vperm.xlu0 %2705, %v2411_v15  }
 0x509   : > { %2430 = vperm.xlu1 %2707, %v2412_v14  }
 0x564   : > { %v2193_v24 = vpop.permute.xlu0 %2192 }
 0x565   : > { %v2212_v7 = vmul.f32 %v2193_v24, %v4217_v12  ;;  %v2213_v17 = vmul.f32 %v2193_v24, %v4220_v41 }
 0x567   : > { %v2228_v23 = vadd.f32 3.0, %v2212_v7  ;;  %v2229_v51 = vadd.f32 3.0, %v2213_v17 }
 0x568   : > { %v2198_v27 = vpop.permute.xlu1 %2197  ;;  %v2183_v50 = vpop.permute.xlu0 %2182 }
 0x569   : > { %v2214_v20 = vmul.f32 %v2198_v27, %v4275_v36  ;;  %v2215_v22 = vmul.f32 %v2198_v27, %v4278_v6  ;;  %v2244_v56 = vmax.f32 %v2228_v23, 0.0  ;;  %v2245_v8 = vmax.f32 %v2229_v51, 0.0 }
 0x56a   : > { %v2208_v39 = vmul.f32 %v2183_v50, %v4229_v5  ;;  %v2209_v0 = vmul.f32 %v2183_v50, %v4238_v58 }
 0x56b   : > { %v2230_v10 = vadd.f32 3.0, %v2214_v20  ;;  %v2231_v44 = vadd.f32 3.0, %v2215_v22  ;;  %v2260_v33 = vmin.f32 %v2244_v56, 6.0  ;;  %v2261_v12 = vmin.f32 %v2245_v8, 6.0 }
 0x56c   : > { %v2224_v9 = vadd.f32 3.0, %v2208_v39  ;;  %v2225_v41 = vadd.f32 3.0, %v2209_v0  ;;  %v2188_v25 = vpop.permute.xlu1 %2187  ;;  %v2173_v30 = vpop.permute.xlu0 %2172 }
 0x56d   : > { %v2246_v54 = vmax.f32 %v2230_v10, 0.0  ;;  %v2247_v32 = vmax.f32 %v2231_v44, 0.0  ;;  %v2210_v36 = vmul.f32 %v2188_v25, %v4243_v61  ;;  %v2276_v45 = vmul.f32 0.16666667, %v2260_v33 }
 0x56e   : > { %v2240_v6 = vmax.f32 %v2224_v9, 0.0  ;;  %v2241_v42 = vmax.f32 %v2225_v41, 0.0  ;;  %v2211_v40 = vmul.f32 %v2188_v25, %v4246_v4  ;;  %v4440_v58 = vmul.f32 %v2173_v30, %v4280_v18 }
 0x56f   : > { %v2262_v5 = vmin.f32 %v2246_v54, 6.0  ;;  %v2263_v34 = vmin.f32 %v2247_v32, 6.0  ;;  %v4443_v26 = vmul.f32 %v2173_v30, %v4282_v35  ;;  %v2277_v38 = vmul.f32 0.16666667, %v2261_v12 }
 0x570   : > { %v2256_v63 = vmin.f32 %v2240_v6, 6.0  ;;  %v2257_v46 = vmin.f32 %v2241_v42, 6.0  ;;  %v2220_v61 = vadd.f32 3.0, %v4440_v58  ;;  %v2226_v48 = vadd.f32 3.0, %v2210_v36  ;;  %v2163_v4 = vpop.permute.xlu0 %2162  ;;  %v2178_v3 = vpop.permute.xlu1 %2177 }
 0x571   : > { %v2278_v49 = vmul.f32 0.16666667, %v2262_v5  ;;  %v2279_v43 = vmul.f32 0.16666667, %v2263_v34  ;;  %v2221_v16 = vadd.f32 3.0, %v4443_v26  ;;  %v2227_v28 = vadd.f32 3.0, %v2211_v40 }
 0x572   : > { %v2292_v60 = vmul.f32 %v2276_v45, %v2212_v7  ;;  %v2272_v53 = vmul.f32 0.16666667, %v2256_v63  ;;  %v2236_v18 = vmax.f32 %v2220_v61, 0.0  ;;  %v2293_v21 = vmul.f32 %v2277_v38, %v2213_v17 }
 0x573   : > { %v2237_v31 = vmax.f32 %v2221_v16, 0.0  ;;  %v2273_v35 = vmul.f32 0.16666667, %v2257_v46  ;;  %v2242_v62 = vmax.f32 %v2226_v48, 0.0  ;;  %v2243_v29 = vmax.f32 %v2227_v28, 0.0 }
 0x574   : > { %v2294_v37 = vmul.f32 %v2278_v49, %v2214_v20  ;;  %v2295_v47 = vmul.f32 %v2279_v43, %v2215_v22  ;;  %v2252_v11 = vmin.f32 %v2236_v18, 6.0  ;;  %v2200_v1 = vmul.f32 %v2163_v4, %v4314_v2  ;;  %v2168_v20 = vpop.permute.xlu1 %2167 }
 0x575   : > { %v2258_v15 = vmin.f32 %v2242_v62, 6.0  ;;  %v2259_v14 = vmin.f32 %v2243_v29, 6.0  ;;  %v2201_v24 = vmul.f32 %v2163_v4, %v4316_v57  ;;  %v2206_v23 = vmul.f32 %v2178_v3, %v4323_v19  ;;  %v2717_v62 = vld [vmem:[%s4550_s13] sm:$0xff]   ;;  %v2718_v29 = vld [vmem:[%s4550_s13 + $0x8] sm:$0xff]  }
 0x576   : > { %v2288_v51 = vmul.f32 %v2272_v53, %v2208_v39  ;;  %v2253_v7 = vmin.f32 %v2237_v31, 6.0  ;;  %v2216_v27 = vadd.f32 3.0, %v2200_v1  ;;  %v2207_v50 = vmul.f32 %v2178_v3, %v4325_v13 }
 0x577   : > { %v2274_v17 = vmul.f32 0.16666667, %v2258_v15  ;;  %v2275_v56 = vmul.f32 0.16666667, %v2259_v14  ;;  %v2217_v8 = vadd.f32 3.0, %v2201_v24  ;;  %v2222_v10 = vadd.f32 3.0, %v2206_v23 }
 0x578   : > { %v2289_v22 = vmul.f32 %v2273_v35, %v2209_v0  ;;  %v2306_v44 = vpack.c.bf16 %v2294_v37, %v2292_v60  ;;  %v2232_v33 = vmax.f32 %v2216_v27, 0.0  ;;  %v2223_v2 = vadd.f32 3.0, %v2207_v50  ;;  %v2384_v37 = vpop.permute.xlu0 %2383  ;;  %v2719_v27 = vld [vmem:[%s2954_s23] sm:$0xff] }
 0x579   : > { %v2268_v12 = vmul.f32 0.16666667, %v2252_v11  ;;  %v2291_v9 = vmul.f32 %v2275_v56, %v2211_v40  ;;  %v2233_v41 = vmax.f32 %v2217_v8, 0.0  ;;  %v2238_v57 = vmax.f32 %v2222_v10, 0.0 }
 0x57a   : > { %v2290_v25 = vmul.f32 %v2274_v17, %v2210_v36  ;;  %v2239_v19 = vmax.f32 %v2223_v2, 0.0  ;;  %v2202_v39 = vmul.f32 %v2168_v20, %v4362_v59  ;;  %v2203_v54 = vmul.f32 %v2168_v20, %v4364_v52  ;;  %v2720_v20 = vld [vmem:[%s2954_s23 + $0x8] sm:$0xff] }
 0x57b   : > { %v2269_v13 = vmul.f32 0.16666667, %v2253_v7  ;;  %v2248_v32 = vmin.f32 %v2232_v33, 6.0  ;;  %v2254_v30 = vmin.f32 %v2238_v57, 6.0  ;;  %v2307_v45 = vpack.c.bf16 %v2295_v47, %v2293_v21  ;;  %v2389_v47 = vpop.permute.xlu1 %2388 }
 0x57c   : > { %v2249_v6 = vmin.f32 %v2233_v41, 6.0  ;;  %v2255_v42 = vmin.f32 %v2239_v19, 6.0  ;;  %v2218_v0 = vadd.f32 3.0, %v2202_v39  ;;  %v2219_v5 = vadd.f32 3.0, %v2203_v54  ;;  %v2394_v11 = vpop.permute.xlu0 %2393 }
 0x57d   : > { %v2270_v34 = vmul.f32 0.16666667, %v2254_v30  ;;  %2332 = vmatprep.subr.bf16.mxu0 %v2307_v45  ;;  %v2305_v38 = vpack.c.bf16 %v2291_v9, %v2289_v22  ;;  %v2304_v40 = vpack.c.bf16 %v2290_v25, %v2288_v51  ;;  %v2284_v59 = vmul.f32 %v2268_v12, %v4440_v58  ;;  %v2721_v12 = vld [vmem:[%s2954_s23 + $0x10] sm:$0xff]  ;;  %v2723_v45 = vld [vmem:[%s2954_s23 + $0x20] sm:$0xff] }
 0x57e   : > { %v2271_v63 = vmul.f32 0.16666667, %v2255_v42  ;;  %v2234_v46 = vmax.f32 %v2218_v0, 0.0  ;;  %v2235_v36 = vmax.f32 %v2219_v5, 0.0  ;;  %2333 = vmatpush1.bf16.msra.mxu0 %v2306_v44  ;;  %v2285_v52 = vmul.f32 %v2269_v13, %v4443_v26 }
 0x57f   : > { %v2264_v49 = vmul.f32 0.16666667, %v2248_v32  ;;  %v2286_v43 = vmul.f32 %v2270_v34, %v2206_v23  ;;  %2334 = vmatprep.subr.bf16.mxu0 %v2305_v38  ;;  %v2265_v61 = vmul.f32 0.16666667, %v2249_v6  ;;  %v2724_v38 = vld [vmem:[%s2954_s23 + $0x28] sm:$0xff] }
 0x580   : > { %v2287_v16 = vmul.f32 %v2271_v63, %v2207_v50  ;;  %v2250_v48 = vmin.f32 %v2234_v46, 6.0  ;;  %v2251_v28 = vmin.f32 %v2235_v36, 6.0  ;;  %v2725_v36 = vld [vmem:[%s2954_s23 + $0x30] sm:$0xff] }
 0x581   : > { %v2302_v4 = vpack.c.bf16 %v2286_v43, %v2284_v59  ;;  %v2280_v18 = vmul.f32 %v2264_v49, %v2200_v1  ;;  %v2281_v31 = vmul.f32 %v2265_v61, %v2201_v24  ;;  %v2399_v1 = vpop.permute.xlu1 %2398  ;;  %v2416_v24 = vpop.permute.xlu0 %2415  ;;  %v2726_v49 = vld [vmem:[%s2954_s23 + $0x38] sm:$0xff] }
 0x582   : > { %v2266_v3 = vmul.f32 0.16666667, %v2250_v48  ;;  %v2267_v60 = vmul.f32 0.16666667, %v2251_v28  ;;  %2335 = vmatpush1.bf16.msra.mxu0 %v2304_v40  ;;  %v2303_v53 = vpack.c.bf16 %v2287_v16, %v2285_v52 }
 0x584   : > { %v2282_v21 = vmul.f32 %v2266_v3, %v2202_v39  ;;  %v2283_v35 = vmul.f32 %v2267_v60, %v2203_v54  ;;  %2336 = vmatprep.subr.bf16.mxu0 %v2303_v53  ;;  %v2722_v39 = vld [vmem:[%s2954_s23 + $0x18] sm:$0xff] }
 0x585   : > { %v2421_v8 = vpop.permute.xlu1 %2420  ;;  %v2426_v25 = vpop.permute.xlu0 %2425 }
 0x586   : > { %v2300_v58 = vpack.c.bf16 %v2282_v21, %v2280_v18  ;;  %2337 = vmatpush1.bf16.msra.mxu0 %v2302_v4  ;;  %v2301_v26 = vpack.c.bf16 %v2283_v35, %v2281_v31 }
 0x588   : > { %2338 = vmatprep.subr.bf16.mxu0 %v2301_v26 }
 0x589   : > { %v2431_v5 = vpop.permute.xlu1 %2430 }
 0x58a   : > { %2339 = vmatpush1.bf16.msra.mxu0 %v2300_v58 }
 0x58d   : > { %2560 = vmatmul.mubr.msk.bf16.vlgmr.msra.gmra.mxu0 %vm1926_vm2, %v2717_v62 }
 0x58e   : > { %2366 = vmatprep.mubr.bf16.mxu0 %v4760_v55 }
 0x595   : > { %2561 = vmatmul.mubr.msk.bf16.gmra.mxu0 %vm1926_vm2, %v2718_v29 }
 0x64d   : > { %v2358_v15 = vpop.f32.mrf.mxu0 }
 0x64e   : > { %v2401_v14 = vmul.f32 %v2384_v37, %v2358_v15 }
 0x64f   : > { %v2360_v23 = vpop.f32.mrf.mxu0 }
 0x650   : > { %v2433_v55 = vadd.f32 %v2416_v24, %v2401_v14  ;;  %v2402_v51 = vmul.f32 %v2384_v37, %v2360_v23 }
 0x651   : > { %v2362_v7 = vpop.f32.mrf.mxu0 }
 0x652   : > { %v2441_v50 = vadd.f32 %v2719_v27, %v2433_v55  ;;  %v2434_v17 = vadd.f32 %v2416_v24, %v2402_v51  ;;  %v2403_v56 = vmul.f32 %v2389_v47, %v2362_v7 }
 0x653   : > { %v2364_v10 = vpop.f32.mrf.mxu0 }
 0x654   : > { %2449 = vst [vmem:[%s4468_s21] sm:$0xff] %v2441_v50  ;;  %v2442_v22 = vadd.f32 %v2720_v20, %v2434_v17  ;;  %v2435_v44 = vadd.f32 %v2421_v8, %v2403_v56  ;;  %v2404_v33 = vmul.f32 %v2389_v47, %v2364_v10 }
 0x655   : > { %v2368_v2 = vpop.f32.mrf.mxu0 }
 0x656   : > { %2450 = vst [vmem:[%s4468_s21 + $0x8] sm:$0xff] %v2442_v22  ;;  %v2443_v9 = vadd.f32 %v2721_v12, %v2435_v44  ;;  %v2436_v41 = vadd.f32 %v2421_v8, %v2404_v33  ;;  %v2405_v57 = vmul.f32 %v2394_v11, %v2368_v2 }
 0x657   : > { %v2370_v19 = vpop.f32.mrf.mxu0 }
 0x658   : > { %2451 = vst [vmem:[%s4468_s21 + $0x10] sm:$0xff] %v2443_v9  ;;  %v2444_v54 = vadd.f32 %v2722_v39, %v2436_v41  ;;  %v2437_v13 = vadd.f32 %v2426_v25, %v2405_v57  ;;  %v2406_v32 = vmul.f32 %v2394_v11, %v2370_v19 }
 0x659   : > { %v2372_v30 = vpop.f32.mrf.mxu0 }
 0x65a   : > { %2452 = vst [vmem:[%s4468_s21 + $0x18] sm:$0xff] %v2444_v54  ;;  %v2445_v6 = vadd.f32 %v2723_v45, %v2437_v13  ;;  %v2438_v42 = vadd.f32 %v2426_v25, %v2406_v32  ;;  %v2407_v0 = vmul.f32 %v2399_v1, %v2372_v30 }
 0x65b   : > { %v2374_v34 = vpop.f32.mrf.mxu0 }
 0x65c   : > { %2453 = vst [vmem:[%s4468_s21 + $0x20] sm:$0xff] %v2445_v6  ;;  %v2446_v40 = vadd.f32 %v2724_v38, %v2438_v42  ;;  %v2439_v63 = vadd.f32 %v2431_v5, %v2407_v0  ;;  %v2408_v46 = vmul.f32 %v2399_v1, %v2374_v34 }
 0x65e   : > { %2454 = vst [vmem:[%s4468_s21 + $0x28] sm:$0xff] %v2446_v40  ;;  %v2447_v59 = vadd.f32 %v2725_v36, %v2439_v63  ;;  %v2440_v52 = vadd.f32 %v2431_v5, %v2408_v46 }
 0x660   : > { %2455 = vst [vmem:[%s4468_s21 + $0x30] sm:$0xff] %v2447_v59  ;;  %v2448_v43 = vadd.f32 %v2726_v49, %v2440_v52 }
 0x662   : > { %2456 = vst [vmem:[%s4468_s21 + $0x38] sm:$0xff] %v2448_v43 }
 0x663   : > { %2740 = shalt.err (!%p2737_p3)
}
 0x664   : > { %s2741_s23 = scalar_lea.hbm %s4487_s28, 1024  ;;  %s2745_s30 = scalar_lea.hbm %s4553_s16, 2048 }
 0x665   : > { %p2742_p4 = scmp.ne.s32.totalorder %s4487_s28, %s2741_s23  ;;  %p2746_p9 = scmp.lt.s32.totalorder %s4487_s28, %s4553_s16 }
 0x666   : > { %p2747_p10 = scmp.lt.s32.totalorder %s2745_s30, %s2741_s23 }
 0x667   : > { %p2743_p7 = pnand %p2742_p4, %p2929_p5 }
 0x668   : > { %p2748_p11 = por %p2747_p10, %p2746_p9 }
 0x669   : > { %p2744_p8 = pneg %p2743_p7 }
 0x66b   : > { %p2749_p12 = pnand %p2748_p11, %p2744_p8 }
 0x66d   : > { %2752 = shalt.err (!%p2749_p12)
}
 0x66e   : > { %s2805_s17 = smov 256   ;;  %s4811_s18 = smov 16  }
 0x66f   : > { %2605 = dma.vmem_to_hbm [thread:$0]  (%p2929_p5), %s4491_s27, 1024, %s4487_s28, %s4496_s25, %s2805_s17, %s2805_s17, %s4811_s18  }
 0x670 PF: > { %s4812_s19 = sld [smem:[#allocation5_spill]]  ;;  %p2611_p13 = scmp.ge.s32.totalorder %s2787_s24, 2 }
 0x672   : > { %p2608_p0 = pnand %p2611_p13, %p2933_p6 }
 0x674   : > { %p2609_p1 = pneg %p2608_p0 }
 0x676   : > { %s2486_s21 = sand.u32 1, %s4812_s19  }
 0x677   : > { %s2487_s23 = scalar_lea.sflag [#allocation3], %s2486_s21 }
 0x678   : > { %2770 = dma.done.wait (%p2609_p1), %s2487_s23, 1024  }
 0x679   : > { %2772 = vsyncadd (%p2609_p1), %s2487_s23, 4294966272  ;;  %s4814_s24 = sld [smem:[#allocation7_spill]]  ;;  %s4817_s21 = smov %s2779_s22 }
 0x67a   : > { %s4815_s0 = sld [smem:[#allocation6_spill]] }
 0x67b   : > { %s4816_s23 = sld [smem:[#allocation8_spill]] }
 0x67f   : > { %p26_p2 = scmp.ge.s32.totalorder %s4814_s24, 4  }
 0x680   : > { %s4818_s22 = smov %s4815_s0 }
 0x681   :  { %28 = sbr.rel (!%p26_p2) target bundleno = 5 (0x5), region = 119 }
 0x686   :  { %2492 = vsyncpa [#allocation3], 1 }
 0x687   :  { %2494 = vsyncpa [#allocation3 + $0x1], 1 }

</bundles_post_ra>
